<compile_context>
chip_gen: v7x
topology: tpu7x:2x2x1
jax: 0.10.0
libtpu: 0.0.40
codegen_flags: <defaults>
</compile_context>

<pallas_src>
import jax
import jax.numpy as jnp
import numpy as np
from jax.experimental import pallas as pl
from jax.experimental.pallas import tpu as pltpu


# ----------------------------------------------------------------------------
# Fused kernel: conv(3x3, pad=1) + bias + ReLU + Linear(F -> 10)
#   x_ref   : (B, C_in, H, W)        VMEM
#   cw_ref  : (C_out*C_in*9,)        SMEM  (flattened conv weights, scalar reads)
#   cb_ref  : (C_out,)               SMEM
#   fw_ref  : (10, F)                VMEM  (torch fc weight layout, F = C_out*H*W)
#   fb_ref  : (1, 10)                VMEM
#   o_ref   : (B, 10)                VMEM
#   xp_ref  : (B, C_in, H+2, W+2)    VMEM scratch (zero-padded input)
#   act_ref : (B, F)                 VMEM scratch (lane-dense flattened activations)
# ----------------------------------------------------------------------------
def fused_cnn_kernel(x_ref, cw_ref, cb_ref, fw_ref, fb_ref, o_ref, xp_ref, act_ref):
    B, C_in, H, W = x_ref.shape
    C_out = cb_ref.shape[0]
    HW = H * W

    # --- in-kernel halo padding (pad=1 on both spatial dims) -----------------
    xp_ref[...] = jnp.zeros(xp_ref.shape, xp_ref.dtype)
    xp_ref[:, :, 1:H + 1, 1:W + 1] = x_ref[...]
    xp = xp_ref[...]  # (B, C_in, H+2, W+2), single load

    # --- 3x3 conv + bias + ReLU over the whole batch (VPU shifted FMAs) ------
    for oc in range(C_out):
        acc = jnp.zeros((B, H, W), jnp.float32)
        for ic in range(C_in):
            xc = xp[:, ic]                                    # (B, H+2, W+2)
            # Hoist lane-offset slices: 3 per input channel instead of 9.
            xkw = [xc[:, :, kw:kw + W] for kw in range(3)]    # each (B, H+2, W)
            for kh in range(3):
                for kw in range(3):
                    w_s = cw_ref[(oc * C_in + ic) * 9 + kh * 3 + kw]
                    acc = acc + xkw[kw][:, kh:kh + H, :] * w_s
        acc = jnp.maximum(acc + cb_ref[oc], 0.0)

        # Flatten (C, H, W) row-major into the lane-dense (B, F) activation
        # scratch with static-offset row stores (torch.flatten(x, 1) order).
        base = oc * HW
        for h in range(H):
            act_ref[:, base + h * W: base + (h + 1) * W] = acc[:, h, :]

    # --- FC: y = act @ fc_w.T + b  (contract dim 1 with dim 1; no transpose) -
    y = jax.lax.dot_general(
        act_ref[...], fw_ref[...],
        dimension_numbers=(((1,), (1,)), ((), ())),
        preferred_element_type=jnp.float32)
    o_ref[...] = (y + fb_ref[...]).astype(o_ref.dtype)


@jax.jit
def simple_cnn_forward(x, conv_w, conv_b, fc_w, fc_b):
    """x: (B, 3, H, W) f32. conv_w: (C_out, 3, 3, 3). fc_w: (10, C_out*H*W)."""
    B, C_in, H, W = x.shape
    C_out = conv_w.shape[0]
    F = C_out * H * W
    N = fc_w.shape[0]

    cw_flat = conv_w.reshape(-1).astype(jnp.float32)
    cb = conv_b.astype(jnp.float32)
    fw = fc_w.astype(jnp.float32)
    fb = fc_b.reshape(1, N).astype(jnp.float32)

    return pl.pallas_call(
        fused_cnn_kernel,
        out_shape=jax.ShapeDtypeStruct((B, N), jnp.float32),
        in_specs=[
            pl.BlockSpec(memory_space=pltpu.MemorySpace.VMEM),   # x
            pl.BlockSpec(memory_space=pltpu.MemorySpace.SMEM),   # conv weights (flat)
            pl.BlockSpec(memory_space=pltpu.MemorySpace.SMEM),   # conv bias
            pl.BlockSpec(memory_space=pltpu.MemorySpace.VMEM),   # fc weight (10, F)
            pl.BlockSpec(memory_space=pltpu.MemorySpace.VMEM),   # fc bias (1, 10)
        ],
        out_specs=pl.BlockSpec(memory_space=pltpu.MemorySpace.VMEM),
        scratch_shapes=[
            pltpu.VMEM((B, C_in, H + 2, W + 2), jnp.float32),    # padded input
            pltpu.VMEM((B, F), jnp.float32),                     # lane-dense activations
        ],
    )(x.astype(jnp.float32), cw_flat, cb, fw, fb)


def reference_forward(x, conv_w, conv_b, fc_w, fc_b):
    """Pure-JAX reference matching the PyTorch forward."""
    y = jax.lax.conv_general_dilated(
        x, conv_w, window_strides=(1, 1), padding=((1, 1), (1, 1)),
        dimension_numbers=("NCHW", "OIHW", "NCHW"))
    y = y + conv_b.reshape(1, -1, 1, 1)
    y = y.reshape(x.shape[0], -1)
    y = jnp.maximum(y, 0.0)
    return y @ fc_w.T + fc_b


if __name__ == "__main__":
    # Small shapes consistent with the module: resolution=16, out_channels=1.
    B, C_in, RES, C_OUT = 2, 3, 16, 1
    F = C_OUT * RES * RES

    key = jax.random.PRNGKey(0)
    k_x, k_cw, k_cb, k_fw, k_fb = jax.random.split(key, 5)

    x = jax.random.normal(k_x, (B, C_in, RES, RES), jnp.float32)
    conv_w = jax.random.normal(k_cw, (C_OUT, C_in, 3, 3), jnp.float32) * 0.1
    conv_b = jax.random.normal(k_cb, (C_OUT,), jnp.float32) * 0.1
    fc_w = jax.random.normal(k_fw, (10, F), jnp.float32) * 0.05
    fc_b = jax.random.normal(k_fb, (10,), jnp.float32) * 0.05

    out = simple_cnn_forward(x, conv_w, conv_b, fc_w, fc_b)
    out = jax.block_until_ready(out)

    ref = reference_forward(x, conv_w, conv_b, fc_w, fc_b)
    assert out.shape == (B, 10)
    np.testing.assert_allclose(np.asarray(out), np.asarray(ref), rtol=1e-4, atol=1e-4)

    print("KERNEL_OK")
</pallas_src>

<mosaic_0001>
module attributes {stable_mosaic.version = 11 : i64} {
  func.func @fused_cnn_kernel(%arg0: memref<2x3x16x16xf32, #tpu.memory_space<vmem>>, %arg1: memref<27xf32, #tpu.memory_space<smem>>, %arg2: memref<1xf32, #tpu.memory_space<smem>>, %arg3: memref<10x256xf32, #tpu.memory_space<vmem>>, %arg4: memref<1x10xf32, #tpu.memory_space<vmem>>, %arg5: memref<2x10xf32, #tpu.memory_space<vmem>>, %arg6: memref<2x3x18x18xf32, #tpu.memory_space<vmem>>, %arg7: memref<2x256xf32, #tpu.memory_space<vmem>>) attributes {dimension_semantics = [], scalar_prefetch = 0 : i64, scratch_operands = 2 : i64, tpu.core_type = #tpu.core_type<tc>} {
    %cst = arith.constant 0.000000e+00 : f32
    %0 = vector.broadcast %cst : f32 to vector<2x3x18x18xf32>
    %c0 = arith.constant 0 : index
    %c0_0 = arith.constant 0 : index
    %c0_1 = arith.constant 0 : index
    %c0_2 = arith.constant 0 : index
    %1 = vector.load %arg6[%c0, %c0_0, %c0_1, %c0_2] : memref<2x3x18x18xf32, #tpu.memory_space<vmem>>, vector<2x3x18x18xf32>
    tpu.vector_store %arg6[%c0, %c0_0, %c0_1, %c0_2], %0 {strides = array<i32>} : memref<2x3x18x18xf32, #tpu.memory_space<vmem>>, vector<2x3x18x18xf32>,
    %c0_3 = arith.constant 0 : index
    %c0_4 = arith.constant 0 : index
    %c0_5 = arith.constant 0 : index
    %c0_6 = arith.constant 0 : index
    %2 = vector.load %arg0[%c0_3, %c0_4, %c0_5, %c0_6] : memref<2x3x16x16xf32, #tpu.memory_space<vmem>>, vector<2x3x16x16xf32>
    %c0_7 = arith.constant 0 : index
    %c0_8 = arith.constant 0 : index
    %c1 = arith.constant 1 : index
    %c1_9 = arith.constant 1 : index
    %3 = vector.load %arg6[%c0_7, %c0_8, %c1, %c1_9] : memref<2x3x18x18xf32, #tpu.memory_space<vmem>>, vector<2x3x16x16xf32>
    tpu.vector_store %arg6[%c0_7, %c0_8, %c1, %c1_9], %2 {strides = array<i32>} : memref<2x3x18x18xf32, #tpu.memory_space<vmem>>, vector<2x3x16x16xf32>,
    %c0_10 = arith.constant 0 : index
    %c0_11 = arith.constant 0 : index
    %c0_12 = arith.constant 0 : index
    %c0_13 = arith.constant 0 : index
    %4 = vector.load %arg6[%c0_10, %c0_11, %c0_12, %c0_13] : memref<2x3x18x18xf32, #tpu.memory_space<vmem>>, vector<2x3x18x18xf32>
    %cst_14 = arith.constant 0.000000e+00 : f32
    %5 = vector.broadcast %cst_14 : f32 to vector<2x16x16xf32>
    %6 = vector.extract_strided_slice %4 {offsets = [0, 0, 0, 0], sizes = [2, 1, 18, 18], strides = [1, 1, 1, 1]} : vector<2x3x18x18xf32> to vector<2x1x18x18xf32>
    %7 = vector.shape_cast %6 : vector<2x1x18x18xf32> to vector<2x18x18xf32>
    %8 = vector.extract_strided_slice %7 {offsets = [0, 0, 0], sizes = [2, 18, 16], strides = [1, 1, 1]} : vector<2x18x18xf32> to vector<2x18x16xf32>
    %9 = vector.extract_strided_slice %7 {offsets = [0, 0, 1], sizes = [2, 18, 16], strides = [1, 1, 1]} : vector<2x18x18xf32> to vector<2x18x16xf32>
    %10 = vector.extract_strided_slice %7 {offsets = [0, 0, 2], sizes = [2, 18, 16], strides = [1, 1, 1]} : vector<2x18x18xf32> to vector<2x18x16xf32>
    %c0_15 = arith.constant 0 : index
    %11 = memref.load %arg1[%c0_15] : memref<27xf32, #tpu.memory_space<smem>>
    %12 = vector.extract_strided_slice %8 {offsets = [0, 0, 0], sizes = [2, 16, 16], strides = [1, 1, 1]} : vector<2x18x16xf32> to vector<2x16x16xf32>
    %13 = vector.broadcast %11 : f32 to vector<2x16x16xf32>
    %14 = arith.mulf %12, %13 : vector<2x16x16xf32>
    %15 = arith.addf %5, %14 : vector<2x16x16xf32>
    %c1_16 = arith.constant 1 : index
    %16 = memref.load %arg1[%c1_16] : memref<27xf32, #tpu.memory_space<smem>>
    %17 = vector.extract_strided_slice %9 {offsets = [0, 0, 0], sizes = [2, 16, 16], strides = [1, 1, 1]} : vector<2x18x16xf32> to vector<2x16x16xf32>
    %18 = vector.broadcast %16 : f32 to vector<2x16x16xf32>
    %19 = arith.mulf %17, %18 : vector<2x16x16xf32>
    %20 = arith.addf %15, %19 : vector<2x16x16xf32>
    %c2 = arith.constant 2 : index
    %21 = memref.load %arg1[%c2] : memref<27xf32, #tpu.memory_space<smem>>
    %22 = vector.extract_strided_slice %10 {offsets = [0, 0, 0], sizes = [2, 16, 16], strides = [1, 1, 1]} : vector<2x18x16xf32> to vector<2x16x16xf32>
    %23 = vector.broadcast %21 : f32 to vector<2x16x16xf32>
    %24 = arith.mulf %22, %23 : vector<2x16x16xf32>
    %25 = arith.addf %20, %24 : vector<2x16x16xf32>
    %c3 = arith.constant 3 : index
    %26 = memref.load %arg1[%c3] : memref<27xf32, #tpu.memory_space<smem>>
    %27 = vector.extract_strided_slice %8 {offsets = [0, 1, 0], sizes = [2, 16, 16], strides = [1, 1, 1]} : vector<2x18x16xf32> to vector<2x16x16xf32>
    %28 = vector.broadcast %26 : f32 to vector<2x16x16xf32>
    %29 = arith.mulf %27, %28 : vector<2x16x16xf32>
    %30 = arith.addf %25, %29 : vector<2x16x16xf32>
    %c4 = arith.constant 4 : index
    %31 = memref.load %arg1[%c4] : memref<27xf32, #tpu.memory_space<smem>>
    %32 = vector.extract_strided_slice %9 {offsets = [0, 1, 0], sizes = [2, 16, 16], strides = [1, 1, 1]} : vector<2x18x16xf32> to vector<2x16x16xf32>
    %33 = vector.broadcast %31 : f32 to vector<2x16x16xf32>
    %34 = arith.mulf %32, %33 : vector<2x16x16xf32>
    %35 = arith.addf %30, %34 : vector<2x16x16xf32>
    %c5 = arith.constant 5 : index
    %36 = memref.load %arg1[%c5] : memref<27xf32, #tpu.memory_space<smem>>
    %37 = vector.extract_strided_slice %10 {offsets = [0, 1, 0], sizes = [2, 16, 16], strides = [1, 1, 1]} : vector<2x18x16xf32> to vector<2x16x16xf32>
    %38 = vector.broadcast %36 : f32 to vector<2x16x16xf32>
    %39 = arith.mulf %37, %38 : vector<2x16x16xf32>
    %40 = arith.addf %35, %39 : vector<2x16x16xf32>
    %c6 = arith.constant 6 : index
    %41 = memref.load %arg1[%c6] : memref<27xf32, #tpu.memory_space<smem>>
    %42 = vector.extract_strided_slice %8 {offsets = [0, 2, 0], sizes = [2, 16, 16], strides = [1, 1, 1]} : vector<2x18x16xf32> to vector<2x16x16xf32>
    %43 = vector.broadcast %41 : f32 to vector<2x16x16xf32>
    %44 = arith.mulf %42, %43 : vector<2x16x16xf32>
    %45 = arith.addf %40, %44 : vector<2x16x16xf32>
    %c7 = arith.constant 7 : index
    %46 = memref.load %arg1[%c7] : memref<27xf32, #tpu.memory_space<smem>>
    %47 = vector.extract_strided_slice %9 {offsets = [0, 2, 0], sizes = [2, 16, 16], strides = [1, 1, 1]} : vector<2x18x16xf32> to vector<2x16x16xf32>
    %48 = vector.broadcast %46 : f32 to vector<2x16x16xf32>
    %49 = arith.mulf %47, %48 : vector<2x16x16xf32>
    %50 = arith.addf %45, %49 : vector<2x16x16xf32>
    %c8 = arith.constant 8 : index
    %51 = memref.load %arg1[%c8] : memref<27xf32, #tpu.memory_space<smem>>
    %52 = vector.extract_strided_slice %10 {offsets = [0, 2, 0], sizes = [2, 16, 16], strides = [1, 1, 1]} : vector<2x18x16xf32> to vector<2x16x16xf32>
    %53 = vector.broadcast %51 : f32 to vector<2x16x16xf32>
    %54 = arith.mulf %52, %53 : vector<2x16x16xf32>
    %55 = arith.addf %50, %54 : vector<2x16x16xf32>
    %56 = vector.extract_strided_slice %4 {offsets = [0, 1, 0, 0], sizes = [2, 1, 18, 18], strides = [1, 1, 1, 1]} : vector<2x3x18x18xf32> to vector<2x1x18x18xf32>
    %57 = vector.shape_cast %56 : vector<2x1x18x18xf32> to vector<2x18x18xf32>
    %58 = vector.extract_strided_slice %57 {offsets = [0, 0, 0], sizes = [2, 18, 16], strides = [1, 1, 1]} : vector<2x18x18xf32> to vector<2x18x16xf32>
    %59 = vector.extract_strided_slice %57 {offsets = [0, 0, 1], sizes = [2, 18, 16], strides = [1, 1, 1]} : vector<2x18x18xf32> to vector<2x18x16xf32>
    %60 = vector.extract_strided_slice %57 {offsets = [0, 0, 2], sizes = [2, 18, 16], strides = [1, 1, 1]} : vector<2x18x18xf32> to vector<2x18x16xf32>
    %c9 = arith.constant 9 : index
    %61 = memref.load %arg1[%c9] : memref<27xf32, #tpu.memory_space<smem>>
    %62 = vector.extract_strided_slice %58 {offsets = [0, 0, 0], sizes = [2, 16, 16], strides = [1, 1, 1]} : vector<2x18x16xf32> to vector<2x16x16xf32>
    %63 = vector.broadcast %61 : f32 to vector<2x16x16xf32>
    %64 = arith.mulf %62, %63 : vector<2x16x16xf32>
    %65 = arith.addf %55, %64 : vector<2x16x16xf32>
    %c10 = arith.constant 10 : index
    %66 = memref.load %arg1[%c10] : memref<27xf32, #tpu.memory_space<smem>>
    %67 = vector.extract_strided_slice %59 {offsets = [0, 0, 0], sizes = [2, 16, 16], strides = [1, 1, 1]} : vector<2x18x16xf32> to vector<2x16x16xf32>
    %68 = vector.broadcast %66 : f32 to vector<2x16x16xf32>
    %69 = arith.mulf %67, %68 : vector<2x16x16xf32>
    %70 = arith.addf %65, %69 : vector<2x16x16xf32>
    %c11 = arith.constant 11 : index
    %71 = memref.load %arg1[%c11] : memref<27xf32, #tpu.memory_space<smem>>
    %72 = vector.extract_strided_slice %60 {offsets = [0, 0, 0], sizes = [2, 16, 16], strides = [1, 1, 1]} : vector<2x18x16xf32> to vector<2x16x16xf32>
    %73 = vector.broadcast %71 : f32 to vector<2x16x16xf32>
    %74 = arith.mulf %72, %73 : vector<2x16x16xf32>
    %75 = arith.addf %70, %74 : vector<2x16x16xf32>
    %c12 = arith.constant 12 : index
    %76 = memref.load %arg1[%c12] : memref<27xf32, #tpu.memory_space<smem>>
    %77 = vector.extract_strided_slice %58 {offsets = [0, 1, 0], sizes = [2, 16, 16], strides = [1, 1, 1]} : vector<2x18x16xf32> to vector<2x16x16xf32>
    %78 = vector.broadcast %76 : f32 to vector<2x16x16xf32>
    %79 = arith.mulf %77, %78 : vector<2x16x16xf32>
    %80 = arith.addf %75, %79 : vector<2x16x16xf32>
    %c13 = arith.constant 13 : index
    %81 = memref.load %arg1[%c13] : memref<27xf32, #tpu.memory_space<smem>>
    %82 = vector.extract_strided_slice %59 {offsets = [0, 1, 0], sizes = [2, 16, 16], strides = [1, 1, 1]} : vector<2x18x16xf32> to vector<2x16x16xf32>
    %83 = vector.broadcast %81 : f32 to vector<2x16x16xf32>
    %84 = arith.mulf %82, %83 : vector<2x16x16xf32>
    %85 = arith.addf %80, %84 : vector<2x16x16xf32>
    %c14 = arith.constant 14 : index
    %86 = memref.load %arg1[%c14] : memref<27xf32, #tpu.memory_space<smem>>
    %87 = vector.extract_strided_slice %60 {offsets = [0, 1, 0], sizes = [2, 16, 16], strides = [1, 1, 1]} : vector<2x18x16xf32> to vector<2x16x16xf32>
    %88 = vector.broadcast %86 : f32 to vector<2x16x16xf32>
    %89 = arith.mulf %87, %88 : vector<2x16x16xf32>
    %90 = arith.addf %85, %89 : vector<2x16x16xf32>
    %c15 = arith.constant 15 : index
    %91 = memref.load %arg1[%c15] : memref<27xf32, #tpu.memory_space<smem>>
    %92 = vector.extract_strided_slice %58 {offsets = [0, 2, 0], sizes = [2, 16, 16], strides = [1, 1, 1]} : vector<2x18x16xf32> to vector<2x16x16xf32>
    %93 = vector.broadcast %91 : f32 to vector<2x16x16xf32>
    %94 = arith.mulf %92, %93 : vector<2x16x16xf32>
    %95 = arith.addf %90, %94 : vector<2x16x16xf32>
    %c16 = arith.constant 16 : index
    %96 = memref.load %arg1[%c16] : memref<27xf32, #tpu.memory_space<smem>>
    %97 = vector.extract_strided_slice %59 {offsets = [0, 2, 0], sizes = [2, 16, 16], strides = [1, 1, 1]} : vector<2x18x16xf32> to vector<2x16x16xf32>
    %98 = vector.broadcast %96 : f32 to vector<2x16x16xf32>
    %99 = arith.mulf %97, %98 : vector<2x16x16xf32>
    %100 = arith.addf %95, %99 : vector<2x16x16xf32>
    %c17 = arith.constant 17 : index
    %101 = memref.load %arg1[%c17] : memref<27xf32, #tpu.memory_space<smem>>
    %102 = vector.extract_strided_slice %60 {offsets = [0, 2, 0], sizes = [2, 16, 16], strides = [1, 1, 1]} : vector<2x18x16xf32> to vector<2x16x16xf32>
    %103 = vector.broadcast %101 : f32 to vector<2x16x16xf32>
    %104 = arith.mulf %102, %103 : vector<2x16x16xf32>
    %105 = arith.addf %100, %104 : vector<2x16x16xf32>
    %106 = vector.extract_strided_slice %4 {offsets = [0, 2, 0, 0], sizes = [2, 1, 18, 18], strides = [1, 1, 1, 1]} : vector<2x3x18x18xf32> to vector<2x1x18x18xf32>
    %107 = vector.shape_cast %106 : vector<2x1x18x18xf32> to vector<2x18x18xf32>
    %108 = vector.extract_strided_slice %107 {offsets = [0, 0, 0], sizes = [2, 18, 16], strides = [1, 1, 1]} : vector<2x18x18xf32> to vector<2x18x16xf32>
    %109 = vector.extract_strided_slice %107 {offsets = [0, 0, 1], sizes = [2, 18, 16], strides = [1, 1, 1]} : vector<2x18x18xf32> to vector<2x18x16xf32>
    %110 = vector.extract_strided_slice %107 {offsets = [0, 0, 2], sizes = [2, 18, 16], strides = [1, 1, 1]} : vector<2x18x18xf32> to vector<2x18x16xf32>
    %c18 = arith.constant 18 : index
    %111 = memref.load %arg1[%c18] : memref<27xf32, #tpu.memory_space<smem>>
    %112 = vector.extract_strided_slice %108 {offsets = [0, 0, 0], sizes = [2, 16, 16], strides = [1, 1, 1]} : vector<2x18x16xf32> to vector<2x16x16xf32>
    %113 = vector.broadcast %111 : f32 to vector<2x16x16xf32>
    %114 = arith.mulf %112, %113 : vector<2x16x16xf32>
    %115 = arith.addf %105, %114 : vector<2x16x16xf32>
    %c19 = arith.constant 19 : index
    %116 = memref.load %arg1[%c19] : memref<27xf32, #tpu.memory_space<smem>>
    %117 = vector.extract_strided_slice %109 {offsets = [0, 0, 0], sizes = [2, 16, 16], strides = [1, 1, 1]} : vector<2x18x16xf32> to vector<2x16x16xf32>
    %118 = vector.broadcast %116 : f32 to vector<2x16x16xf32>
    %119 = arith.mulf %117, %118 : vector<2x16x16xf32>
    %120 = arith.addf %115, %119 : vector<2x16x16xf32>
    %c20 = arith.constant 20 : index
    %121 = memref.load %arg1[%c20] : memref<27xf32, #tpu.memory_space<smem>>
    %122 = vector.extract_strided_slice %110 {offsets = [0, 0, 0], sizes = [2, 16, 16], strides = [1, 1, 1]} : vector<2x18x16xf32> to vector<2x16x16xf32>
    %123 = vector.broadcast %121 : f32 to vector<2x16x16xf32>
    %124 = arith.mulf %122, %123 : vector<2x16x16xf32>
    %125 = arith.addf %120, %124 : vector<2x16x16xf32>
    %c21 = arith.constant 21 : index
    %126 = memref.load %arg1[%c21] : memref<27xf32, #tpu.memory_space<smem>>
    %127 = vector.extract_strided_slice %108 {offsets = [0, 1, 0], sizes = [2, 16, 16], strides = [1, 1, 1]} : vector<2x18x16xf32> to vector<2x16x16xf32>
    %128 = vector.broadcast %126 : f32 to vector<2x16x16xf32>
    %129 = arith.mulf %127, %128 : vector<2x16x16xf32>
    %130 = arith.addf %125, %129 : vector<2x16x16xf32>
    %c22 = arith.constant 22 : index
    %131 = memref.load %arg1[%c22] : memref<27xf32, #tpu.memory_space<smem>>
    %132 = vector.extract_strided_slice %109 {offsets = [0, 1, 0], sizes = [2, 16, 16], strides = [1, 1, 1]} : vector<2x18x16xf32> to vector<2x16x16xf32>
    %133 = vector.broadcast %131 : f32 to vector<2x16x16xf32>
    %134 = arith.mulf %132, %133 : vector<2x16x16xf32>
    %135 = arith.addf %130, %134 : vector<2x16x16xf32>
    %c23 = arith.constant 23 : index
    %136 = memref.load %arg1[%c23] : memref<27xf32, #tpu.memory_space<smem>>
    %137 = vector.extract_strided_slice %110 {offsets = [0, 1, 0], sizes = [2, 16, 16], strides = [1, 1, 1]} : vector<2x18x16xf32> to vector<2x16x16xf32>
    %138 = vector.broadcast %136 : f32 to vector<2x16x16xf32>
    %139 = arith.mulf %137, %138 : vector<2x16x16xf32>
    %140 = arith.addf %135, %139 : vector<2x16x16xf32>
    %c24 = arith.constant 24 : index
    %141 = memref.load %arg1[%c24] : memref<27xf32, #tpu.memory_space<smem>>
    %142 = vector.extract_strided_slice %108 {offsets = [0, 2, 0], sizes = [2, 16, 16], strides = [1, 1, 1]} : vector<2x18x16xf32> to vector<2x16x16xf32>
    %143 = vector.broadcast %141 : f32 to vector<2x16x16xf32>
    %144 = arith.mulf %142, %143 : vector<2x16x16xf32>
    %145 = arith.addf %140, %144 : vector<2x16x16xf32>
    %c25 = arith.constant 25 : index
    %146 = memref.load %arg1[%c25] : memref<27xf32, #tpu.memory_space<smem>>
    %147 = vector.extract_strided_slice %109 {offsets = [0, 2, 0], sizes = [2, 16, 16], strides = [1, 1, 1]} : vector<2x18x16xf32> to vector<2x16x16xf32>
    %148 = vector.broadcast %146 : f32 to vector<2x16x16xf32>
    %149 = arith.mulf %147, %148 : vector<2x16x16xf32>
    %150 = arith.addf %145, %149 : vector<2x16x16xf32>
    %c26 = arith.constant 26 : index
    %151 = memref.load %arg1[%c26] : memref<27xf32, #tpu.memory_space<smem>>
    %152 = vector.extract_strided_slice %110 {offsets = [0, 2, 0], sizes = [2, 16, 16], strides = [1, 1, 1]} : vector<2x18x16xf32> to vector<2x16x16xf32>
    %153 = vector.broadcast %151 : f32 to vector<2x16x16xf32>
    %154 = arith.mulf %152, %153 : vector<2x16x16xf32>
    %155 = arith.addf %150, %154 : vector<2x16x16xf32>
    %c0_17 = arith.constant 0 : index
    %156 = memref.load %arg2[%c0_17] : memref<1xf32, #tpu.memory_space<smem>>
    %157 = vector.broadcast %156 : f32 to vector<2x16x16xf32>
    %158 = arith.addf %155, %157 : vector<2x16x16xf32>
    %cst_18 = arith.constant 0.000000e+00 : f32
    %159 = vector.broadcast %cst_18 : f32 to vector<2x16x16xf32>
    %160 = arith.maximumf %158, %159 : vector<2x16x16xf32>
    %161 = vector.extract_strided_slice %160 {offsets = [0, 0, 0], sizes = [2, 1, 16], strides = [1, 1, 1]} : vector<2x16x16xf32> to vector<2x1x16xf32>
    %162 = vector.shape_cast %161 : vector<2x1x16xf32> to vector<2x16xf32>
    %c0_19 = arith.constant 0 : index
    %c0_20 = arith.constant 0 : index
    %163 = vector.load %arg7[%c0_19, %c0_20] : memref<2x256xf32, #tpu.memory_space<vmem>>, vector<2x16xf32>
    tpu.vector_store %arg7[%c0_19, %c0_20], %162 {strides = array<i32>} : memref<2x256xf32, #tpu.memory_space<vmem>>, vector<2x16xf32>,
    %164 = vector.extract_strided_slice %160 {offsets = [0, 1, 0], sizes = [2, 1, 16], strides = [1, 1, 1]} : vector<2x16x16xf32> to vector<2x1x16xf32>
    %165 = vector.shape_cast %164 : vector<2x1x16xf32> to vector<2x16xf32>
    %c0_21 = arith.constant 0 : index
    %c16_22 = arith.constant 16 : index
    %166 = vector.load %arg7[%c0_21, %c16_22] : memref<2x256xf32, #tpu.memory_space<vmem>>, vector<2x16xf32>
    tpu.vector_store %arg7[%c0_21, %c16_22], %165 {strides = array<i32>} : memref<2x256xf32, #tpu.memory_space<vmem>>, vector<2x16xf32>,
    %167 = vector.extract_strided_slice %160 {offsets = [0, 2, 0], sizes = [2, 1, 16], strides = [1, 1, 1]} : vector<2x16x16xf32> to vector<2x1x16xf32>
    %168 = vector.shape_cast %167 : vector<2x1x16xf32> to vector<2x16xf32>
    %c0_23 = arith.constant 0 : index
    %c32 = arith.constant 32 : index
    %169 = vector.load %arg7[%c0_23, %c32] : memref<2x256xf32, #tpu.memory_space<vmem>>, vector<2x16xf32>
    tpu.vector_store %arg7[%c0_23, %c32], %168 {strides = array<i32>} : memref<2x256xf32, #tpu.memory_space<vmem>>, vector<2x16xf32>,
    %170 = vector.extract_strided_slice %160 {offsets = [0, 3, 0], sizes = [2, 1, 16], strides = [1, 1, 1]} : vector<2x16x16xf32> to vector<2x1x16xf32>
    %171 = vector.shape_cast %170 : vector<2x1x16xf32> to vector<2x16xf32>
    %c0_24 = arith.constant 0 : index
    %c48 = arith.constant 48 : index
    %172 = vector.load %arg7[%c0_24, %c48] : memref<2x256xf32, #tpu.memory_space<vmem>>, vector<2x16xf32>
    tpu.vector_store %arg7[%c0_24, %c48], %171 {strides = array<i32>} : memref<2x256xf32, #tpu.memory_space<vmem>>, vector<2x16xf32>,
    %173 = vector.extract_strided_slice %160 {offsets = [0, 4, 0], sizes = [2, 1, 16], strides = [1, 1, 1]} : vector<2x16x16xf32> to vector<2x1x16xf32>
    %174 = vector.shape_cast %173 : vector<2x1x16xf32> to vector<2x16xf32>
    %c0_25 = arith.constant 0 : index
    %c64 = arith.constant 64 : index
    %175 = vector.load %arg7[%c0_25, %c64] : memref<2x256xf32, #tpu.memory_space<vmem>>, vector<2x16xf32>
    tpu.vector_store %arg7[%c0_25, %c64], %174 {strides = array<i32>} : memref<2x256xf32, #tpu.memory_space<vmem>>, vector<2x16xf32>,
    %176 = vector.extract_strided_slice %160 {offsets = [0, 5, 0], sizes = [2, 1, 16], strides = [1, 1, 1]} : vector<2x16x16xf32> to vector<2x1x16xf32>
    %177 = vector.shape_cast %176 : vector<2x1x16xf32> to vector<2x16xf32>
    %c0_26 = arith.constant 0 : index
    %c80 = arith.constant 80 : index
    %178 = vector.load %arg7[%c0_26, %c80] : memref<2x256xf32, #tpu.memory_space<vmem>>, vector<2x16xf32>
    tpu.vector_store %arg7[%c0_26, %c80], %177 {strides = array<i32>} : memref<2x256xf32, #tpu.memory_space<vmem>>, vector<2x16xf32>,
    %179 = vector.extract_strided_slice %160 {offsets = [0, 6, 0], sizes = [2, 1, 16], strides = [1, 1, 1]} : vector<2x16x16xf32> to vector<2x1x16xf32>
    %180 = vector.shape_cast %179 : vector<2x1x16xf32> to vector<2x16xf32>
    %c0_27 = arith.constant 0 : index
    %c96 = arith.constant 96 : index
    %181 = vector.load %arg7[%c0_27, %c96] : memref<2x256xf32, #tpu.memory_space<vmem>>, vector<2x16xf32>
    tpu.vector_store %arg7[%c0_27, %c96], %180 {strides = array<i32>} : memref<2x256xf32, #tpu.memory_space<vmem>>, vector<2x16xf32>,
    %182 = vector.extract_strided_slice %160 {offsets = [0, 7, 0], sizes = [2, 1, 16], strides = [1, 1, 1]} : vector<2x16x16xf32> to vector<2x1x16xf32>
    %183 = vector.shape_cast %182 : vector<2x1x16xf32> to vector<2x16xf32>
    %c0_28 = arith.constant 0 : index
    %c112 = arith.constant 112 : index
    %184 = vector.load %arg7[%c0_28, %c112] : memref<2x256xf32, #tpu.memory_space<vmem>>, vector<2x16xf32>
    tpu.vector_store %arg7[%c0_28, %c112], %183 {strides = array<i32>} : memref<2x256xf32, #tpu.memory_space<vmem>>, vector<2x16xf32>,
    %185 = vector.extract_strided_slice %160 {offsets = [0, 8, 0], sizes = [2, 1, 16], strides = [1, 1, 1]} : vector<2x16x16xf32> to vector<2x1x16xf32>
    %186 = vector.shape_cast %185 : vector<2x1x16xf32> to vector<2x16xf32>
    %c0_29 = arith.constant 0 : index
    %c128 = arith.constant 128 : index
    %187 = vector.load %arg7[%c0_29, %c128] : memref<2x256xf32, #tpu.memory_space<vmem>>, vector<2x16xf32>
    tpu.vector_store %arg7[%c0_29, %c128], %186 {strides = array<i32>} : memref<2x256xf32, #tpu.memory_space<vmem>>, vector<2x16xf32>,
    %188 = vector.extract_strided_slice %160 {offsets = [0, 9, 0], sizes = [2, 1, 16], strides = [1, 1, 1]} : vector<2x16x16xf32> to vector<2x1x16xf32>
    %189 = vector.shape_cast %188 : vector<2x1x16xf32> to vector<2x16xf32>
    %c0_30 = arith.constant 0 : index
    %c144 = arith.constant 144 : index
    %190 = vector.load %arg7[%c0_30, %c144] : memref<2x256xf32, #tpu.memory_space<vmem>>, vector<2x16xf32>
    tpu.vector_store %arg7[%c0_30, %c144], %189 {strides = array<i32>} : memref<2x256xf32, #tpu.memory_space<vmem>>, vector<2x16xf32>,
    %191 = vector.extract_strided_slice %160 {offsets = [0, 10, 0], sizes = [2, 1, 16], strides = [1, 1, 1]} : vector<2x16x16xf32> to vector<2x1x16xf32>
    %192 = vector.shape_cast %191 : vector<2x1x16xf32> to vector<2x16xf32>
    %c0_31 = arith.constant 0 : index
    %c160 = arith.constant 160 : index
    %193 = vector.load %arg7[%c0_31, %c160] : memref<2x256xf32, #tpu.memory_space<vmem>>, vector<2x16xf32>
    tpu.vector_store %arg7[%c0_31, %c160], %192 {strides = array<i32>} : memref<2x256xf32, #tpu.memory_space<vmem>>, vector<2x16xf32>,
    %194 = vector.extract_strided_slice %160 {offsets = [0, 11, 0], sizes = [2, 1, 16], strides = [1, 1, 1]} : vector<2x16x16xf32> to vector<2x1x16xf32>
    %195 = vector.shape_cast %194 : vector<2x1x16xf32> to vector<2x16xf32>
    %c0_32 = arith.constant 0 : index
    %c176 = arith.constant 176 : index
    %196 = vector.load %arg7[%c0_32, %c176] : memref<2x256xf32, #tpu.memory_space<vmem>>, vector<2x16xf32>
    tpu.vector_store %arg7[%c0_32, %c176], %195 {strides = array<i32>} : memref<2x256xf32, #tpu.memory_space<vmem>>, vector<2x16xf32>,
    %197 = vector.extract_strided_slice %160 {offsets = [0, 12, 0], sizes = [2, 1, 16], strides = [1, 1, 1]} : vector<2x16x16xf32> to vector<2x1x16xf32>
    %198 = vector.shape_cast %197 : vector<2x1x16xf32> to vector<2x16xf32>
    %c0_33 = arith.constant 0 : index
    %c192 = arith.constant 192 : index
    %199 = vector.load %arg7[%c0_33, %c192] : memref<2x256xf32, #tpu.memory_space<vmem>>, vector<2x16xf32>
    tpu.vector_store %arg7[%c0_33, %c192], %198 {strides = array<i32>} : memref<2x256xf32, #tpu.memory_space<vmem>>, vector<2x16xf32>,
    %200 = vector.extract_strided_slice %160 {offsets = [0, 13, 0], sizes = [2, 1, 16], strides = [1, 1, 1]} : vector<2x16x16xf32> to vector<2x1x16xf32>
    %201 = vector.shape_cast %200 : vector<2x1x16xf32> to vector<2x16xf32>
    %c0_34 = arith.constant 0 : index
    %c208 = arith.constant 208 : index
    %202 = vector.load %arg7[%c0_34, %c208] : memref<2x256xf32, #tpu.memory_space<vmem>>, vector<2x16xf32>
    tpu.vector_store %arg7[%c0_34, %c208], %201 {strides = array<i32>} : memref<2x256xf32, #tpu.memory_space<vmem>>, vector<2x16xf32>,
    %203 = vector.extract_strided_slice %160 {offsets = [0, 14, 0], sizes = [2, 1, 16], strides = [1, 1, 1]} : vector<2x16x16xf32> to vector<2x1x16xf32>
    %204 = vector.shape_cast %203 : vector<2x1x16xf32> to vector<2x16xf32>
    %c0_35 = arith.constant 0 : index
    %c224 = arith.constant 224 : index
    %205 = vector.load %arg7[%c0_35, %c224] : memref<2x256xf32, #tpu.memory_space<vmem>>, vector<2x16xf32>
    tpu.vector_store %arg7[%c0_35, %c224], %204 {strides = array<i32>} : memref<2x256xf32, #tpu.memory_space<vmem>>, vector<2x16xf32>,
    %206 = vector.extract_strided_slice %160 {offsets = [0, 15, 0], sizes = [2, 1, 16], strides = [1, 1, 1]} : vector<2x16x16xf32> to vector<2x1x16xf32>
    %207 = vector.shape_cast %206 : vector<2x1x16xf32> to vector<2x16xf32>
    %c0_36 = arith.constant 0 : index
    %c240 = arith.constant 240 : index
    %208 = vector.load %arg7[%c0_36, %c240] : memref<2x256xf32, #tpu.memory_space<vmem>>, vector<2x16xf32>
    tpu.vector_store %arg7[%c0_36, %c240], %207 {strides = array<i32>} : memref<2x256xf32, #tpu.memory_space<vmem>>, vector<2x16xf32>,
    %c0_37 = arith.constant 0 : index
    %c0_38 = arith.constant 0 : index
    %209 = vector.load %arg7[%c0_37, %c0_38] : memref<2x256xf32, #tpu.memory_space<vmem>>, vector<2x256xf32>
    %c0_39 = arith.constant 0 : index
    %c0_40 = arith.constant 0 : index
    %210 = vector.load %arg3[%c0_39, %c0_40] : memref<10x256xf32, #tpu.memory_space<vmem>>, vector<10x256xf32>
    %cst_41 = arith.constant dense<0.000000e+00> : vector<2x10xf32>
    %211 = tpu.matmul %209, %210, %cst_41 {dimension_numbers = #tpu.dot_dimension_numbers<[1], [1], [0], [0], [0, 0, 1, 0], [], []>} : vector<2x256xf32>, vector<10x256xf32>, vector<2x10xf32> -> vector<2x10xf32>
    %c0_42 = arith.constant 0 : index
    %c0_43 = arith.constant 0 : index
    %212 = vector.load %arg4[%c0_42, %c0_43] : memref<1x10xf32, #tpu.memory_space<vmem>>, vector<1x10xf32>
    %213 = vector.broadcast %212 : vector<1x10xf32> to vector<2x10xf32>
    %214 = arith.addf %211, %213 : vector<2x10xf32>
    %c0_44 = arith.constant 0 : index
    %c0_45 = arith.constant 0 : index
    %215 = vector.load %arg5[%c0_44, %c0_45] : memref<2x10xf32, #tpu.memory_space<vmem>>, vector<2x10xf32>
    tpu.vector_store %arg5[%c0_44, %c0_45], %214 {strides = array<i32>} : memref<2x10xf32, #tpu.memory_space<vmem>>, vector<2x10xf32>,
    return
  }
}

</mosaic_0001>

<bundles_post_ra>
// kernel: simple_cnn_forward.1
= control target key start
LH: loop header
LB: loop body
LE: loop exit
PB: predicated region body
PF: predicated region fallthrough
CT: control target
= control target key end

     0   :  { %11 = vsyncpa [#allocation6], 0  ;;  %s2644_s0 = inlined_call_operand.hbm [shape: f32[2,3,16,16], index: 0, kind: input, shape index: {}]   ;;  %s2645_s1 = inlined_call_operand.vmem [shape: f32[27], index: 1, kind: input, shape index: {}]   ;;  %s2646_s2 = inlined_call_operand.<no memory space> [shape: f32[1], index: 2, kind: input, shape index: {}]   ;;  %s2647_s3 = inlined_call_operand.vmem [shape: f32[10,256], index: 3, kind: input, shape index: {}]   ;;  %s2648_s4 = inlined_call_operand.vmem [shape: f32[1,10], index: 4, kind: input, shape index: {}]   ;;  %s2649_s5 = inlined_call_operand.hbm [shape: f32[2,10], index: 5, kind: output, shape index: {}]  }
   0x1   :  { %12 = vsyncpa [#allocation8], 0 }
   0x2   :  { %13 = vsyncpa [#allocation7], 0  ;;  %s1510_s18 = smov [#allocation5]   ;;  %s32_s22 = sshll.u32 %s2645_s1, 4  ;;  %s33_s22 = int_to_ptr.vmem [resolvable:$true] %s32_s22 }
   0x3   :  { %s19_s19 = sshll.u32 %s1510_s18, 4  ;;  %s1448_s25 = scalar_lea.hbm %s2644_s0, 1536  ;;  %s20_s19 = int_to_ptr.vmem [resolvable:$true] %s19_s19 }
   0x4   :  { %p1449_p0 = scmp.ne.s32.totalorder %s2644_s0, %s1448_s25  ;;  %p1452_p1 = scmp.lt.u32.totalorder %s1448_s25, %s2644_s0 }
   0x6   :  { %p1454_p2 = pnand %p1452_p1, %p1449_p0 }
   0x8   :  { %1457 = shalt.err (!%p1454_p2)
}
   0x9   :  { %s1458_s30 = scalar_lea.vmem %s20_s19, 1536  ;;  %p1463_p4 = scmp.lt.s32.totalorder %s20_s19, %s20_s19 }
   0xa   :  { %p1459_p3 = scmp.ne.s32.totalorder %s20_s19, %s1458_s30  ;;  %p1464_p5 = scmp.lt.s32.totalorder %s1458_s30, %s1458_s30 }
   0xc   :  { %p1465_p6 = por %p1464_p5, %p1463_p4 }
   0xe   :  { %p1466_p7 = pnand %p1465_p6, %p1459_p3 }
  0x10   :  { %1469 = shalt.err (!%p1466_p7)
}
  0x11   :  { %s1511_s1 = smov 128   ;;  %s1512_s6 = smov 8  }
  0x12   :  { %25 = dma.hbm_to_vmem [thread:$0]  %s2644_s0, 1536, %s20_s19, [#allocation6], %s1511_s1, %s1511_s1, %s1512_s6  }
  0x13   :  { %s1470_s9 = scalar_lea.vmem %s33_s22, 16  ;;  %p1475_p9 = scmp.lt.s32.totalorder %s33_s22, %s33_s22 }
  0x14   :  { %p1471_p8 = scmp.ne.s32.totalorder %s33_s22, %s1470_s9  ;;  %p1476_p10 = scmp.lt.s32.totalorder %s1470_s9, %s1470_s9 }
  0x16   :  { %p1477_p11 = por %p1476_p10, %p1475_p9 }
  0x18   :  { %p1478_p12 = pnand %p1477_p11, %p1471_p8 }
  0x1a   :  { %1481 = shalt.err (!%p1478_p12)
}
  0x1b   :  { %s1513_s10 = smov [#allocation9]  }
  0x1c   :  { %35 = dma.vmem_to_smem %s33_s22, 16, %s1513_s10, [#allocation8]  }
  0x1d   :  { %1504 = dma.done.wait [#allocation6], 1536  }
  0x1e   :  { %1505 = vsyncadd [#allocation6], 4294965760 }
  0x1f   :  { %1506 = dma.done.wait [#allocation8], 16  }
  0x20   :  { %1507 = vsyncadd [#allocation8], 4294967280 }
  0x21   :  { %48 = sfence }
  0x22   :  { %v75_v0 = vld [vmem:[#allocation5 + $0x30] sm:$0xff]  ;;  %v69_v1 = vld [vmem:[#allocation5] sm:$0xff]  ;;  %vm49_vm0 = vcmask 146432   ;;  %s1514_s11 = smov 1   ;;  %vm52_vm1 = vcmask 140288   ;;  %v76_v2 = vld [vmem:[#allocation5 + $0x38] sm:$0xff] }
  0x23   :  { %105 = vrot.lane.b32.xlu0 %v75_v0, %s1514_s11  ;;  %93 = vrot.lane.b32.xlu1 %v69_v1, %s1514_s11  ;;  %v70_v3 = vld [vmem:[#allocation5 + $0x8] sm:$0xff]  ;;  %v1515_v4 = vmov 0.0   ;;  %v77_v5 = vld [vmem:[#allocation5 + $0x40] sm:$0xff]  ;;  %v71_v7 = vld [vmem:[#allocation5 + $0x10] sm:$0xff]  ;;  %vm129_vm2 = vcmask 138248   ;;  %s1399_s0 = sld [smem:[#allocation9 + $0x1]] }
  0x24   :  { %60 = vst.msk [vmem:[#allocation2 + $0x48] sm:$0xff] %vm49_vm0, %v1515_v4  ;;  %61 = vst.msk [vmem:[#allocation2 + $0x50] sm:$0xff] %vm49_vm0, %v1515_v4  ;;  %v78_v6 = vld [vmem:[#allocation5 + $0x48] sm:$0xff]  ;;  %v72_v8 = vld [vmem:[#allocation5 + $0x18] sm:$0xff]  ;;  %s1400_s12 = sld [smem:[#allocation9 + $0x2]]  ;;  %s1610_s13 = sld [smem:[#allocation9 + $0x4]] }
  0x25   :  { %50 = vst.msk [vmem:[#allocation2] sm:$0xff] %vm49_vm0, %v1515_v4  ;;  %51 = vst.msk [vmem:[#allocation2 + $0x8] sm:$0xff] %vm49_vm0, %v1515_v4  ;;  %v79_v9 = vld [vmem:[#allocation5 + $0x50] sm:$0xff]  ;;  %v80_v10 = vld [vmem:[#allocation5 + $0x58] sm:$0xff]  ;;  %s1615_s14 = sld [smem:[#allocation9 + $0x5]]  ;;  %s1617_s15 = sld [smem:[#allocation9 + $0xa]] }
  0x26   :  { %54 = vst.msk [vmem:[#allocation2 + $0x18] sm:$0xff] %vm49_vm0, %v1515_v4  ;;  %55 = vst.msk [vmem:[#allocation2 + $0x20] sm:$0xff] %vm49_vm0, %v1515_v4  ;;  %v73_v11 = vld [vmem:[#allocation5 + $0x20] sm:$0xff]  ;;  %v74_v12 = vld [vmem:[#allocation5 + $0x28] sm:$0xff]  ;;  %s1619_s16 = sld [smem:[#allocation9 + $0x7]]  ;;  %s1516_s17 = smov 127  }
  0x27   :  { %57 = vst.msk [vmem:[#allocation2 + $0x30] sm:$0xff] %vm49_vm0, %v1515_v4  ;;  %58 = vst.msk [vmem:[#allocation2 + $0x38] sm:$0xff] %vm49_vm0, %v1515_v4  ;;  %107 = vrot.lane.b32.xlu0 %v76_v2, %s1514_s11  ;;  %95 = vrot.lane.b32.xlu1 %v70_v3, %s1514_s11  ;;  %s1623_s18 = sld [smem:[#allocation9 + $0xb]]  ;;  %s1625_s19 = sld [smem:[#allocation9 + $0x8]]  ;;  %vm236_vm3 = vcmask 1046528   ;;  %vm349_vm4 = vcmask 1045504  }
  0x28   :  { %63 = vst.msk [vmem:[#allocation2 + $0x60] sm:$0xff] %vm49_vm0, %v1515_v4  ;;  %64 = vst.msk [vmem:[#allocation2 + $0x68] sm:$0xff] %vm49_vm0, %v1515_v4  ;;  %s1629_s20 = sld [smem:[#allocation9 + $0x13]]  ;;  %s1631_s21 = sld [smem:[#allocation9 + $0xd]]  ;;  %vm1051_vm5 = vcmask 1041409   ;;  %vm1053_vm6 = vcmask 1043459  }
  0x29   :  { %66 = vst.msk [vmem:[#allocation2 + $0x78] sm:$0xff] %vm49_vm0, %v1515_v4  ;;  %67 = vst.msk [vmem:[#allocation2 + $0x80] sm:$0xff] %vm49_vm0, %v1515_v4  ;;  %v171_v17 = vstv %s1399_s0  ;;  %s1636_s22 = sld [smem:[#allocation9 + $0x14]]  ;;  %s1638_s23 = sld [smem:[#allocation9 + $0xe]]  ;;  %vm1055_vm7 = vcmask 1045509   ;;  %vm1057_vm8 = vcmask 1047559  }
  0x2a   :  { %62 = vst.msk [vmem:[#allocation2 + $0x58] sm:$0x3] %vm52_vm1, %v1515_v4  ;;  %53 = vst.msk [vmem:[#allocation2 + $0x10] sm:$0x3] %vm52_vm1, %v1515_v4  ;;  %v197_v29 = vstv %s1400_s12  ;;  %s1642_s24 = sld [smem:[#allocation9 + $0x10]]  ;;  %s1644_s25 = sld [smem:[#allocation9 + $0x11]]  ;;  %v256_v38 = vstv %s1610_s13 }
  0x2b   :  { %56 = vst.msk [vmem:[#allocation2 + $0x28] sm:$0x3] %vm52_vm1, %v1515_v4  ;;  %59 = vst.msk [vmem:[#allocation2 + $0x40] sm:$0x3] %vm52_vm1, %v1515_v4  ;;  %109 = vrot.lane.b32.xlu0 %v77_v5, %s1514_s11  ;;  %111 = vrot.lane.b32.xlu1 %v78_v6, %s1514_s11  ;;  %s1648_s26 = sld [smem:[#allocation9 + $0x16]]  ;;  %s1650_s27 = sld [smem:[#allocation9 + $0x3]]  ;;  %v459_v35 = vstv %s1617_s15  ;;  %v296_v41 = vstv %s1615_s14 }
  0x2c   :  { %65 = vst.msk [vmem:[#allocation2 + $0x70] sm:$0x3] %vm52_vm1, %v1515_v4  ;;  %68 = vst.msk [vmem:[#allocation2 + $0x88] sm:$0x3] %vm52_vm1, %v1515_v4  ;;  %s1652_s28 = sld [smem:[#allocation9 + $0x17]]  ;;  %s1654_s29 = sld [smem:[#allocation9 + $0x6]]  ;;  %v1684_v42 = vstv %s1619_s16 }
  0x2d   :  { %s1660_s30 = sld [smem:[#allocation9 + $0x19]]  ;;  %s1662_s1 = sld [smem:[#allocation9 + $0x1a]]  ;;  %v1687_v43 = vstv %s1623_s18  ;;  %v1693_v45 = vstv %s1625_s19  ;;  %vm1060_vm9 = vcmask 123904   ;;  %vm1072_vm10 = vcmask 255104  }
  0x2e   :  { %s1664_s6 = sld [smem:[#allocation9 + $0xc]]  ;;  %s1666_s7 = sld [smem:[#allocation9 + $0xf]]  ;;  %v1690_v44 = vstv %s1629_s20  ;;  %v1696_v46 = vstv %s1631_s21  ;;  %vm1086_vm11 = vcmask 386304   ;;  %vm1098_vm12 = vcmask 517504  }
  0x2f   :  { %97 = vrot.lane.b32.xlu0 %v71_v7, %s1514_s11  ;;  %99 = vrot.lane.b32.xlu1 %v72_v8, %s1514_s11  ;;  %s1517_s8 = smov 126   ;;  %s1670_s9 = sld [smem:[#allocation9 + $0x15]]  ;;  %v1702_v48 = vstv %s1636_s22  ;;  %v1705_v49 = vstv %s1638_s23  ;;  %vm1126_vm13 = vcmask 648704   ;;  %vm1138_vm14 = vcmask 779904  }
  0x30   :  { %s1676_s10 = sld [smem:[#allocation9 + $0x18]]  ;;  %v1714_v53 = vstv %s1642_s24  ;;  %v1717_v54 = vstv %s1644_s25  ;;  %s1407_s0 = sld [smem:[#allocation9 + $0x9]]  ;;  %vm1152_vm15 = vcmask 911104   ;;  %vm1164_vm0 = vcmask 1042304  }
  0x31   :  { %v1720_v55 = vstv %s1648_s26  ;;  %v1723_v56 = vstv %s1650_s27  ;;  %s1416_s12 = sld [smem:[#allocation9 + $0x12]]  ;;  %s1520_s15 = smov 32   ;;  %vm1381_vm1 = vcmask 74752  }
  0x32   :  { %2678 = vst [vmem:[#allocation14_spill] sm:$0xff] %v1720_v55  ;;  %v1729_v59 = vstv %s1652_s28  ;;  %v1735_v61 = vstv %s1654_s29  ;;  %s1521_s16 = smov 48   ;;  %s1523_s22 = smov 80  }
  0x33   :  { %113 = vrot.lane.b32.xlu0 %v79_v9, %s1514_s11  ;;  %115 = vrot.lane.b32.xlu1 %v80_v10, %s1514_s11  ;;  %2679 = vst [vmem:[#allocation15_spill] sm:$0xff] %v1729_v59  ;;  %v1732_v60 = vstv %s1660_s30  ;;  %v1739_v63 = vstv %s1662_s1  ;;  %s1524_s27 = smov 96   ;;  %s1525_s28 = smov 112  }
  0x34   :  { %2680 = vst [vmem:[#allocation16_spill] sm:$0xff] %v1739_v63  ;;  %v1742_v0 = vstv %s1664_s6  ;;  %v1745_v1 = vstv %s1666_s7  ;;  %s1526_s30 = smov [#allocation10]  }
  0x35   :  { %v1753_v5 = vstv %s1670_s9  ;;  %s1389_s1 = sshll.u32 %s1526_s30, 4  ;;  %s1390_s1 = int_to_ptr.vmem [resolvable:$true] %s1389_s1 }
  0x36   :  { %v1761_v10 = vstv %s1676_s10  ;;  %s1482_s6 = scalar_lea.vmem %s1390_s1, 32  ;;  %p1487_p0 = scmp.lt.s32.totalorder %s1390_s1, %s1390_s1 }
  0x37   :  { %101 = vrot.lane.b32.xlu0 %v73_v11, %s1514_s11  ;;  %103 = vrot.lane.b32.xlu1 %v74_v12, %s1514_s11  ;;  %s160_s11 = sld [smem:[#allocation9]]  ;;  %p1483_p13 = scmp.ne.s32.totalorder %s1390_s1, %s1482_s6 }
  0x38   :  { %p1488_p1 = scmp.lt.s32.totalorder %s1482_s6, %s1482_s6 }
  0x3a   :  { %p1489_p2 = por %p1488_p1, %p1487_p0 }
  0x3c   :  { %p1490_p3 = pnand %p1489_p2, %p1483_p13 }
  0x95   :  { %v106_v13 = vpop.permute.xlu0 %105  ;;  %v94_v14 = vpop.permute.xlu1 %93 }
  0x96   :  { %136 = vst.msk [vmem:[#allocation2 + $0x49] sm:$0xff] %vm129_vm2, %v106_v13  ;;  %130 = vst.msk [vmem:[#allocation2 + $0x1] sm:$0xff] %vm129_vm2, %v94_v14 }
  0x99   :  { %v108_v15 = vpop.permute.xlu0 %107  ;;  %v96_v16 = vpop.permute.xlu1 %95 }
  0x9a   :  { %137 = vst.msk [vmem:[#allocation2 + $0x51] sm:$0xff] %vm129_vm2, %v108_v15  ;;  %131 = vst.msk [vmem:[#allocation2 + $0x9] sm:$0xff] %vm129_vm2, %v96_v16 }
  0x9d   :  { %v1606_v18 = vld [vmem:[#allocation2 + $0x48] sm:$0xff]  ;;  %v1608_v19 = vld [vmem:[#allocation2] sm:$0xff]  ;;  %v110_v20 = vpop.permute.xlu0 %109  ;;  %v112_v21 = vpop.permute.xlu1 %111 }
  0x9e   :  { %v174_v22 = vmul.f32 %v171_v17, %v1606_v18  ;;  %138 = vst.msk [vmem:[#allocation2 + $0x61] sm:$0xff] %vm129_vm2, %v110_v20  ;;  %139 = vst.msk [vmem:[#allocation2 + $0x69] sm:$0xff] %vm129_vm2, %v112_v21  ;;  %v172_v23 = vmul.f32 %v171_v17, %v1608_v19  ;;  %v200_v33 = vmul.f32 %v197_v29, %v1606_v18 }
  0x9f   :  { %v198_v40 = vmul.f32 %v197_v29, %v1608_v19  ;;  %v257_v7 = vmul.f32 %v256_v38, %v1608_v19  ;;  %v260_v11 = vmul.f32 %v256_v38, %v1606_v18  ;;  %v300_v12 = vmul.f32 %v296_v41, %v1606_v18 }
  0xa0   :  { %184 = vrot.lane.b32.xlu0 %v174_v22, %s1516_s17  ;;  %v297_v13 = vmul.f32 %v296_v41, %v1608_v19  ;;  %v1768_v14 = vmul.f32 %v1684_v42, %v1606_v18  ;;  %v1775_v20 = vmul.f32 %v1684_v42, %v1608_v19 }
  0xa1   :  { %v1627_v24 = vld [vmem:[#allocation2 + $0x50] sm:$0xff]  ;;  %v98_v25 = vpop.permute.xlu0 %97  ;;  %v100_v26 = vpop.permute.xlu1 %99  ;;  %v1640_v28 = vld [vmem:[#allocation2 + $0x8] sm:$0xff]  ;;  %v1711_v52 = vld [vmem:[#allocation2 + $0x58] sm:$0x3] }
  0xa2   :  { %v175_v27 = vmul.f32 %v171_v17, %v1627_v24  ;;  %132 = vst.msk [vmem:[#allocation2 + $0x19] sm:$0xff] %vm129_vm2, %v98_v25  ;;  %133 = vst.msk [vmem:[#allocation2 + $0x21] sm:$0xff] %vm129_vm2, %v100_v26  ;;  %v173_v32 = vmul.f32 %v171_v17, %v1640_v28  ;;  %v201_v39 = vmul.f32 %v197_v29, %v1627_v24  ;;  %v1726_v58 = vld [vmem:[#allocation2 + $0x10] sm:$0x3]  ;;  %v269_v26 = vrot.slane %v257_v7, 1 }
  0xa3   :  { %v199_v57 = vmul.f32 %v197_v29, %v1640_v28  ;;  %v261_v62 = vmul.f32 %v256_v38, %v1627_v24  ;;  %v262_v4 = vmul.f32 %v256_v38, %v1711_v52  ;;  %v258_v8 = vmul.f32 %v256_v38, %v1640_v28 }
  0xa4   :  { %186 = vrot.lane.b32.xlu1 %v175_v27, %s1516_s17  ;;  %180 = vrot.lane.b32.xlu0 %v172_v23, %s1516_s17  ;;  %v259_v9 = vmul.f32 %v256_v38, %v1726_v58  ;;  %v301_v15 = vmul.f32 %v296_v41, %v1627_v24  ;;  %v302_v16 = vmul.f32 %v296_v41, %v1711_v52  ;;  %v309_v38 = vrot.slane %v297_v13, 1 }
  0xa5   :  { %v114_v30 = vpop.permute.xlu0 %113  ;;  %v116_v31 = vpop.permute.xlu1 %115  ;;  %v1672_v34 = vld [vmem:[#allocation2 + $0x60] sm:$0xff]  ;;  %v1707_v50 = vld [vmem:[#allocation2 + $0x68] sm:$0xff]  ;;  %v298_v17 = vmul.f32 %v296_v41, %v1640_v28  ;;  %v275_v22 = vrot.slane %v261_v62, 1  ;;  %v277_v23 = vrot.slane %v262_v4, 1  ;;  %v1782_v25 = vmul.f32 %v1693_v45, %v1606_v18 }
  0xa6   :  { %140 = vst.msk [vmem:[#allocation2 + $0x79] sm:$0xff] %vm129_vm2, %v114_v30  ;;  %141 = vst.msk [vmem:[#allocation2 + $0x81] sm:$0xff] %vm129_vm2, %v116_v31  ;;  %v462_v47 = vmul.f32 %v459_v35, %v1672_v34  ;;  %v463_v2 = vmul.f32 %v459_v35, %v1707_v50  ;;  %v270_v27 = vrot.slane %v258_v8, 1  ;;  %v272_v29 = vrot.slane %v259_v9, 1 }
  0xa7   :  { %v1786_v30 = vmul.f32 %v1693_v45, %v1608_v19  ;;  %v488_v31 = vmul.f32 %v1687_v43, %v1672_v34  ;;  %v1803_v62 = vmul.f32 %v1684_v42, %v1627_v24  ;;  %v387_v4 = vrot.slane %v1768_v14, 2 }
  0xa8   :  { %182 = vrot.lane.b32.xlu1 %v173_v32, %s1516_s17  ;;  %210 = vrot.lane.b32.xlu0 %v200_v33, %s1517_s8  ;;  %v489_v32 = vmul.f32 %v1687_v43, %v1707_v50  ;;  %v274_v33 = vrot.slane %v260_v11, 1  ;;  %v375_v7 = vmul.f32 %v1684_v42, %v1711_v52 }
  0xa9   :  { %v102_v36 = vpop.permute.xlu0 %101  ;;  %v104_v37 = vpop.permute.xlu1 %103  ;;  %v1709_v51 = vld [vmem:[#allocation2 + $0x18] sm:$0xff]  ;;  %v1755_v6 = vld [vmem:[#allocation2 + $0x20] sm:$0xff] }
  0xaa   :  { %134 = vst.msk [vmem:[#allocation2 + $0x31] sm:$0xff] %vm129_vm2, %v102_v36  ;;  %135 = vst.msk [vmem:[#allocation2 + $0x39] sm:$0xff] %vm129_vm2, %v104_v37  ;;  %v460_v3 = vmul.f32 %v459_v35, %v1709_v51  ;;  %v461_v21 = vmul.f32 %v459_v35, %v1755_v6  ;;  %v299_v35 = vmul.f32 %v296_v41, %v1726_v58  ;;  %v315_v36 = vrot.slane %v301_v15, 1 }
  0xab   :  { %v317_v37 = vrot.slane %v302_v16, 1  ;;  %v486_v8 = vmul.f32 %v1687_v43, %v1709_v51  ;;  %v487_v9 = vmul.f32 %v1687_v43, %v1755_v6  ;;  %v1833_v16 = vmul.f32 %v1714_v53, %v1707_v50 }
  0xac   :  { %212 = vrot.lane.b32.xlu1 %v201_v39, %s1517_s8  ;;  %206 = vrot.lane.b32.xlu0 %v198_v40, %s1517_s8  ;;  %v310_v39 = vrot.slane %v298_v17, 1  ;;  %v1796_v40 = vsel %vm236_vm3, %v274_v33, %v275_v22  ;;  %v312_v11 = vrot.slane %v299_v35, 1  ;;  %v388_v17 = vrot.slane %v1803_v62, 2 }
  0xad   :  { %v1805_v41 = vld [vmem:[#allocation2 + $0x78] sm:$0xff]  ;;  %v1826_v15 = vsel %vm236_vm3, %v315_v36, %v317_v37  ;;  %2681 = vst [vmem:[#allocation17_spill] sm:$0xff] %v1833_v16  ;;  %v382_v35 = vrot.slane %v1775_v20, 2  ;;  %v699_v37 = vmul.f32 %v1717_v54, %v1672_v34 }
  0xae   :  { %v1829_v14 = vsel %vm236_vm3, %v309_v38, %v310_v39  ;;  %v748_v43 = vmul.f32 %v1690_v44, %v1805_v41  ;;  %v1856_v33 = vsel %vm236_vm3, %v310_v39, %v312_v11  ;;  %v1863_v38 = vmul.f32 %v1684_v42, %v1726_v58 }
  0xaf   :  { %v1873_v39 = vmul.f32 %v1717_v54, %v1707_v50  ;;  %v696_v11 = vmul.f32 %v1717_v54, %v1709_v51 }
  0xb0   :  { %208 = vrot.lane.b32.xlu1 %v199_v57, %s1517_s8  ;;  %472 = vrot.lane.b32.xlu0 %v462_v47, %s1516_s17  ;;  %v1799_v47 = vsel %vm236_vm3, %v275_v22, %v277_v23  ;;  %v314_v57 = vrot.slane %v300_v12, 1  ;;  %v659_v12 = vmul.f32 %v1714_v53, %v1672_v34  ;;  %v656_v22 = vmul.f32 %v1714_v53, %v1709_v51  ;;  %v1842_v23 = vld [vmem:[#allocation2 + $0x80] sm:$0xff] }
  0xb1   :  { %2683 = vst [vmem:[#allocation19_spill] sm:$0xff] %v1873_v39  ;;  %v749_v20 = vmul.f32 %v1690_v44, %v1842_v23 }
  0xb2   :  { %v1823_v13 = vsel %vm236_vm3, %v314_v57, %v315_v36  ;;  %v668_v36 = vrot.slane %v656_v22, 2  ;;  %v774_v22 = vmul.f32 %v1702_v48, %v1805_v41 }
  0xb4   :  { %474 = vrot.lane.b32.xlu1 %v463_v2, %s1516_s17  ;;  %468 = vrot.lane.b32.xlu0 %v460_v3, %s1516_s17  ;;  %v1808_v2 = vsel %vm236_vm3, %v269_v26, %v270_v27  ;;  %v1811_v3 = vsel %vm236_vm3, %v270_v27, %v272_v29  ;;  %v1844_v26 = vld [vmem:[#allocation2 + $0x30] sm:$0xff]  ;;  %v390_v27 = vrot.slane %v375_v7, 2  ;;  %v1848_v29 = vmul.f32 %v1684_v42, %v1640_v28  ;;  %v1881_v7 = vld [vmem:[#allocation2 + $0x38] sm:$0xff] }
  0xb5   :  { %v746_v42 = vmul.f32 %v1690_v44, %v1844_v26 }
  0xb8   :  { %470 = vrot.lane.b32.xlu1 %v461_v21, %s1516_s17  ;;  %498 = vrot.lane.b32.xlu0 %v488_v31, %s1517_s8  ;;  %v673_v21 = vrot.slane %v659_v12, 2  ;;  %v2650_v31 = vrot.slane %v1833_v16, 2  ;;  %v1887_v12 = vmul.f32 %v1693_v45, %v1627_v24  ;;  %v1904_v16 = vmul.f32 %v1702_v48, %v1844_v26 }
  0xba   :  { %v1868_v57 = vsel %vm349_vm4, %v673_v21, %v2650_v31  ;;  %v1897_v21 = vmul.f32 %v1717_v54, %v1755_v6  ;;  %v708_v31 = vrot.slane %v696_v11, 2  ;;  %2686 = vst [vmem:[#allocation22_spill] sm:$0xff] %v1904_v16  ;;  %v383_v11 = vrot.slane %v1848_v29, 2 }
  0xbb   :  { %v1944_v29 = vsel %vm349_vm4, %v388_v17, %v390_v27  ;;  %v385_v16 = vrot.slane %v1863_v38, 2  ;;  %v1965_v38 = vmul.f32 %v1729_v59, %v1842_v23 }
  0xbc   :  { %500 = vrot.lane.b32.xlu1 %v489_v32, %s1517_s8  ;;  %494 = vrot.lane.b32.xlu0 %v486_v8, %s1517_s8  ;;  %v1853_v32 = vmul.f32 %v1714_v53, %v1755_v6  ;;  %v713_v8 = vrot.slane %v699_v37, 2  ;;  %2685 = vst [vmem:[#allocation21_spill] sm:$0xff] %v1897_v21  ;;  %v427_v37 = vrot.slane %v1782_v25, 2  ;;  %v747_v25 = vmul.f32 %v1690_v44, %v1881_v7 }
  0xbd   :  { %v1938_v44 = vmul.f32 %v1720_v55, %v1881_v7 }
  0xbe   :  { %2682 = vst [vmem:[#allocation18_spill] sm:$0xff] %v1853_v32  ;;  %v2652_v62 = vrot.slane %v1853_v32, 2  ;;  %v1914_v32 = vmul.f32 %v1702_v48, %v1881_v7 }
  0xbf   :  { %2690 = vst [vmem:[#allocation26_spill] sm:$0xff] %v1938_v44 }
  0xc0   :  { %496 = vrot.lane.b32.xlu1 %v487_v9, %s1517_s8  ;;  %758 = vrot.lane.b32.xlu0 %v748_v43, %s1516_s17  ;;  %v1892_v9 = vsel %vm349_vm4, %v668_v36, %v2652_v62  ;;  %v2654_v43 = vrot.slane %v1873_v39, 2  ;;  %v2656_v62 = vrot.slane %v1897_v21, 2  ;;  %2687 = vst [vmem:[#allocation23_spill] sm:$0xff] %v1914_v32 }
  0xc1   :  { %2684 = vst [vmem:[#allocation20_spill] sm:$0xff] %v1892_v9  ;;  %v833_v9 = vmul.f32 %v1720_v55, %v1805_v41 }
  0xc2   :  { %v1909_v36 = vsel %vm349_vm4, %v713_v8, %v2654_v43  ;;  %v775_v8 = vmul.f32 %v1702_v48, %v1842_v23  ;;  %v1927_v43 = vmul.f32 %v1720_v55, %v1842_v23  ;;  %v1932_v32 = vsel %vm349_vm4, %v708_v31, %v2656_v62 }
  0xc3   :  { %2689 = vst [vmem:[#allocation25_spill] sm:$0xff] %v1932_v32  ;;  %v1941_v48 = vsel %vm349_vm4, %v387_v4, %v388_v17  ;;  %v415_v31 = vmul.f32 %v1693_v45, %v1711_v52  ;;  %v2661_v62 = vrot.slane %v1938_v44, 1  ;;  %v428_v4 = vrot.slane %v1887_v12, 2 }
  0xc4   :  { %760 = vrot.lane.b32.xlu1 %v749_v20, %s1516_s17  ;;  %754 = vrot.lane.b32.xlu0 %v746_v42, %s1516_s17  ;;  %2688 = vst [vmem:[#allocation24_spill] sm:$0xff] %v1927_v43  ;;  %v847_v20 = vrot.slane %v833_v9, 1  ;;  %v830_v42 = vmul.f32 %v1720_v55, %v1844_v26  ;;  %v2660_v21 = vrot.slane %v1927_v43, 1  ;;  %v873_v55 = vmul.f32 %v1729_v59, %v1805_v41 }
  0xc5   :  { %v411_v17 = vmul.f32 %v1693_v45, %v1640_v28  ;;  %v412_v43 = vmul.f32 %v1693_v45, %v1726_v58  ;;  %v1993_v45 = vmul.f32 %v1732_v60, %v1842_v23 }
  0xc6   :  { %v842_v9 = vrot.slane %v830_v42, 1  ;;  %v1961_v27 = vsel %vm236_vm3, %v847_v20, %v2660_v21  ;;  %v1968_v42 = vsel %vm349_vm4, %v382_v35, %v383_v11  ;;  %v2668_v20 = vrot.slane %v1965_v38, 1 }
  0xc7   :  { %2691 = vst [vmem:[#allocation27_spill] sm:$0xff] %v1961_v27  ;;  %v870_v21 = vmul.f32 %v1729_v59, %v1844_v26  ;;  %v1983_v35 = vmul.f32 %v1729_v59, %v1881_v7  ;;  %v430_v27 = vrot.slane %v415_v31, 2  ;;  %2693 = vst [vmem:[#allocation29_spill] sm:$0xff] %v1993_v45  ;;  %v423_v59 = vrot.slane %v411_v17, 2 }
  0xc8   :  { %756 = vrot.lane.b32.xlu1 %v747_v25, %s1516_s17  ;;  %784 = vrot.lane.b32.xlu0 %v774_v22, %s1517_s8  ;;  %v422_v25 = vrot.slane %v1786_v30, 2  ;;  %v1974_v12 = vsel %vm236_vm3, %v842_v9, %v2661_v62  ;;  %v887_v22 = vrot.slane %v873_v55, 1  ;;  %v1987_v30 = vmul.f32 %v1696_v46, %v1672_v34 }
  0xc9   :  { %2692 = vst [vmem:[#allocation28_spill] sm:$0xff] %v1974_v12  ;;  %v945_v55 = vmul.f32 %v1732_v60, %v1805_v41  ;;  %v1999_v9 = vsel %vm349_vm4, %v383_v11, %v385_v16  ;;  %v882_v62 = vrot.slane %v870_v21, 1  ;;  %v2667_v44 = vrot.slane %v1983_v35, 1 }
  0xca   :  { %v2004_v31 = vsel %vm236_vm3, %v887_v22, %v2668_v20  ;;  %v2008_v12 = vsel %vm349_vm4, %v427_v37, %v428_v4  ;;  %v425_v39 = vrot.slane %v412_v43, 2  ;;  %v942_v21 = vmul.f32 %v1732_v60, %v1844_v26 }
  0xcb   :  { %v959_v32 = vrot.slane %v945_v55, 2  ;;  %v2016_v16 = vsel %vm236_vm3, %v882_v62, %v2667_v44  ;;  %v2022_v11 = vmul.f32 %v1732_v60, %v1881_v7  ;;  %v2025_v37 = vsel %vm349_vm4, %v428_v4, %v430_v27 }
  0xcc   :  { %786 = vrot.lane.b32.xlu1 %v775_v8, %s1517_s8  ;;  %283 = vrot.lane.b32.xlu0 %v1796_v40, %s1516_s17  ;;  %v2666_v8 = vrot.slane %v1993_v45, 2  ;;  %v2011_v40 = vld [vmem:[#allocation2 + $0x70] sm:$0x3]  ;;  %v2029_v43 = vmul.f32 %v1696_v46, %v1707_v50  ;;  %v561_v17 = vrot.slane %v1987_v30, 1  ;;  %v954_v22 = vrot.slane %v942_v21, 2 }
  0xcd   :  { %2694 = vst [vmem:[#allocation30_spill] sm:$0xff] %v2022_v11  ;;  %v2671_v4 = vrot.slane %v2022_v11, 2  ;;  %v985_v27 = vmul.f32 %v1739_v63, %v1805_v41  ;;  %v2046_v30 = vmul.f32 %v1739_v63, %v1842_v23  ;;  %v2049_v55 = vsel %vm349_vm4, %v422_v25, %v423_v59 }
  0xce   :  { %v2035_v62 = vsel %vm349_vm4, %v959_v32, %v2666_v8  ;;  %v2053_v32 = vmul.f32 %v1696_v46, %v2011_v40  ;;  %v2069_v44 = vmul.f32 %v1739_v63, %v1881_v7  ;;  %v2072_v20 = vsel %vm349_vm4, %v423_v59, %v425_v39 }
  0xcf   :  { %2695 = vst [vmem:[#allocation31_spill] sm:$0xff] %v2035_v62  ;;  %2696 = vst [vmem:[#allocation32_spill] sm:$0xff] %v2046_v30  ;;  %v2064_v21 = vsel %vm349_vm4, %v954_v22, %v2671_v4  ;;  %v999_v8 = vrot.slane %v985_v27, 2  ;;  %v2672_v25 = vrot.slane %v2046_v30, 2  ;;  %v2077_v62 = vmul.f32 %v1696_v46, %v1755_v6  ;;  %v2083_v22 = vld [vmem:[#allocation2 + $0x28] sm:$0x3] }
  0xd0   :  { %285 = vrot.lane.b32.xlu1 %v1799_v47, %s1516_s17  ;;  %279 = vrot.lane.b32.xlu0 %v1808_v2, %s1516_s17  ;;  %v2057_v47 = vmul.f32 %v1696_v46, %v1709_v51  ;;  %v982_v2 = vmul.f32 %v1739_v63, %v1844_v26  ;;  %2697 = vst [vmem:[#allocation33_spill] sm:$0xff] %v2064_v21  ;;  %2698 = vst [vmem:[#allocation34_spill] sm:$0xff] %v2069_v44  ;;  %v2676_v39 = vrot.slane %v2069_v44, 2 }
  0xd1   :  { %v2088_v59 = vsel %vm349_vm4, %v999_v8, %v2672_v25  ;;  %v227_v27 = vmul.f32 %v1723_v56, %v1606_v18  ;;  %v224_v45 = vmul.f32 %v1723_v56, %v1608_v19  ;;  %v226_v63 = vmul.f32 %v1723_v56, %v1726_v58 }
  0xd2   :  { %v994_v11 = vrot.slane %v982_v2, 2  ;;  %2699 = vst [vmem:[#allocation35_spill] sm:$0xff] %v2088_v59  ;;  %v228_v2 = vmul.f32 %v1723_v56, %v1627_v24  ;;  %v225_v59 = vmul.f32 %v1723_v56, %v1640_v28 }
  0xd3   :  { %v242_v25 = vrot.slane %v227_v27, 1  ;;  %v237_v21 = vrot.slane %v224_v45, 1 }
  0xd4   :  { %281 = vrot.lane.b32.xlu1 %v1811_v3, %s1516_s17  ;;  %323 = vrot.lane.b32.xlu0 %v1823_v13, %s1517_s8  ;;  %v229_v13 = vmul.f32 %v1723_v56, %v1711_v52  ;;  %v2104_v8 = vsel %vm349_vm4, %v994_v11, %v2676_v39  ;;  %v243_v30 = vrot.slane %v228_v2, 1  ;;  %v2110_v3 = vmul.f32 %v1696_v46, %v2083_v22 }
  0xd5   :  { %v238_v27 = vrot.slane %v225_v59, 1  ;;  %v340_v2 = vmul.f32 %v1735_v61, %v1606_v18  ;;  %v341_v46 = vmul.f32 %v1735_v61, %v1627_v24  ;;  %v240_v56 = vrot.slane %v226_v63, 1 }
  0xd6   :  { %v245_v4 = vrot.slane %v229_v13, 1  ;;  %v2119_v11 = vsel %vm236_vm3, %v242_v25, %v243_v30  ;;  %v338_v39 = vmul.f32 %v1735_v61, %v1640_v28  ;;  %v339_v63 = vmul.f32 %v1735_v61, %v1726_v58 }
  0xd7   :  { %v2133_v25 = vsel %vm236_vm3, %v237_v21, %v238_v27  ;;  %v355_v59 = vrot.slane %v340_v2, 2  ;;  %v356_v13 = vrot.slane %v341_v46, 2  ;;  %v2138_v44 = vsel %vm236_vm3, %v238_v27, %v240_v56 }
  0xd8   :  { %325 = vrot.lane.b32.xlu1 %v1826_v15, %s1517_s8  ;;  %319 = vrot.lane.b32.xlu0 %v1829_v14, %s1517_s8  ;;  %v2126_v45 = vsel %vm236_vm3, %v243_v30, %v245_v4  ;;  %v342_v15 = vmul.f32 %v1735_v61, %v1711_v52  ;;  %v337_v14 = vmul.f32 %v1735_v61, %v1608_v19  ;;  %v2700_v52 = vrot.slane %v2029_v43, 1 }
  0xd9   :  { %v2153_v27 = vmul.f32 %v1705_v49, %v1672_v34  ;;  %v2156_v2 = vsel %vm349_vm4, %v355_v59, %v356_v13  ;;  %v351_v46 = vrot.slane %v338_v39, 2  ;;  %v2161_v61 = vmul.f32 %v1705_v49, %v1707_v50 }
  0xda   :  { %v358_v4 = vrot.slane %v342_v15, 2  ;;  %v350_v30 = vrot.slane %v337_v14, 2  ;;  %v2149_v21 = vsel %vm236_vm3, %v561_v17, %v2700_v52  ;;  %v515_v56 = vmul.f32 %v1742_v0, %v1672_v34 }
  0xdb   :  { %v516_v15 = vmul.f32 %v1742_v0, %v1707_v50  ;;  %v517_v39 = vmul.f32 %v1742_v0, %v2011_v40  ;;  %v512_v59 = vmul.f32 %v1742_v0, %v1709_v51 }
  0xdc   :  { %321 = vrot.lane.b32.xlu1 %v1856_v33, %s1517_s8  ;;  %396 = vrot.lane.b32.xlu0 %v1941_v48, %s1516_s17  ;;  %v2164_v33 = vsel %vm349_vm4, %v356_v13, %v358_v4  ;;  %v353_v48 = vrot.slane %v339_v63, 2  ;;  %v2167_v17 = vsel %vm349_vm4, %v350_v30, %v351_v46  ;;  %v513_v13 = vmul.f32 %v1742_v0, %v1755_v6 }
  0xdd   :  { %2701 = vst [vmem:[#allocation36_spill] sm:$0xff] %v2164_v33  ;;  %2702 = vst [vmem:[#allocation37_spill] sm:$0xff] %v2167_v17  ;;  %v514_v4 = vmul.f32 %v1742_v0, %v2083_v22  ;;  %v529_v30 = vrot.slane %v515_v56, 1  ;;  %v530_v63 = vrot.slane %v516_v15, 1  ;;  %v532_v52 = vrot.slane %v517_v39, 1 }
  0xde   :  { %v2176_v14 = vsel %vm349_vm4, %v351_v46, %v353_v48  ;;  %v627_v46 = vmul.f32 %v1745_v1, %v1672_v34  ;;  %v524_v48 = vrot.slane %v512_v59, 1  ;;  %v525_v58 = vrot.slane %v513_v13, 1 }
  0xdf   :  { %2703 = vst [vmem:[#allocation38_spill] sm:$0xff] %v2176_v14  ;;  %v527_v14 = vrot.slane %v514_v4, 1  ;;  %v628_v17 = vmul.f32 %v1745_v1, %v1707_v50  ;;  %v2193_v0 = vsel %vm236_vm3, %v529_v30, %v530_v63  ;;  %v624_v59 = vmul.f32 %v1745_v1, %v1709_v51  ;;  %v2216_v4 = vld [vmem:[#allocation2 + $0x88] sm:$0x3] }
  0xe0   :  { %398 = vrot.lane.b32.xlu1 %v1944_v29, %s1516_s17  ;;  %392 = vrot.lane.b32.xlu0 %v1968_v42, %s1516_s17  ;;  %v2196_v29 = vsel %vm236_vm3, %v530_v63, %v532_v52  ;;  %v641_v33 = vrot.slane %v627_v46, 2  ;;  %v629_v42 = vmul.f32 %v1745_v1, %v2011_v40  ;;  %v2201_v56 = vsel %vm236_vm3, %v524_v48, %v525_v58 }
  0xe1   :  { %2704 = vst [vmem:[#allocation39_spill] sm:$0xff] %v2201_v56  ;;  %v2204_v15 = vsel %vm236_vm3, %v525_v58, %v527_v14  ;;  %v642_v39 = vrot.slane %v628_v17, 2  ;;  %v2214_v13 = vmul.f32 %v1705_v49, %v2011_v40  ;;  %v625_v58 = vmul.f32 %v1745_v1, %v1755_v6  ;;  %v2236_v56 = vld [vmem:[#allocation2 + $0x40] sm:$0x3] }
  0xe2   :  { %2705 = vst [vmem:[#allocation40_spill] sm:$0xff] %v2204_v15  ;;  %v644_v30 = vrot.slane %v629_v42, 2  ;;  %v626_v17 = vmul.f32 %v1745_v1, %v2083_v22  ;;  %v2706_v14 = vrot.slane %v2053_v32, 1  ;;  %v636_v46 = vrot.slane %v624_v59, 2 }
  0xe3   :  { %v2229_v52 = vsel %vm349_vm4, %v641_v33, %v642_v39  ;;  %v584_v48 = vmul.f32 %v1705_v49, %v1709_v51  ;;  %v637_v15 = vrot.slane %v625_v58, 2  ;;  %v802_v32 = vmul.f32 %v1753_v5, %v1842_v23 }
  0xe4   :  { %394 = vrot.lane.b32.xlu1 %v1999_v9, %s1516_s17  ;;  %436 = vrot.lane.b32.xlu0 %v2008_v12, %s1517_s8  ;;  %v2707_v9 = vrot.slane %v2029_v43, 1  ;;  %v559_v12 = vrot.slane %v2110_v3, 1  ;;  %2708 = vst [vmem:[#allocation41_spill] sm:$0xff] %v2229_v52  ;;  %v2234_v42 = vsel %vm349_vm4, %v642_v39, %v644_v30  ;;  %v639_v1 = vrot.slane %v626_v17, 2 }
  0xe5   :  { %2709 = vst [vmem:[#allocation42_spill] sm:$0xff] %v2234_v42  ;;  %v801_v43 = vmul.f32 %v1753_v5, %v1805_v41  ;;  %v803_v3 = vmul.f32 %v1753_v5, %v2216_v4  ;;  %v798_v33 = vmul.f32 %v1753_v5, %v1844_v26  ;;  %v601_v39 = vrot.slane %v2153_v27, 1 }
  0xe6   :  { %v565_v63 = vsel %vm236_vm3, %v2707_v9, %v2706_v14  ;;  %v2252_v59 = vsel %vm349_vm4, %v636_v46, %v637_v15  ;;  %v2255_v30 = vsel %vm349_vm4, %v637_v15, %v639_v1  ;;  %v799_v58 = vmul.f32 %v1753_v5, %v1881_v7 }
  0xe7   :  { %v815_v17 = vrot.slane %v801_v43, 1  ;;  %v816_v14 = vrot.slane %v802_v32, 1  ;;  %v818_v9 = vrot.slane %v803_v3, 1  ;;  %v810_v42 = vrot.slane %v798_v33, 1 }
  0xe8   :  { %438 = vrot.lane.b32.xlu1 %v2025_v37, %s1517_s8  ;;  %432 = vrot.lane.b32.xlu0 %v2049_v55, %s1517_s8  ;;  %v811_v52 = vrot.slane %v799_v58, 1  ;;  %v800_v37 = vmul.f32 %v1753_v5, %v2236_v56  ;;  %v913_v55 = vmul.f32 %v1761_v10, %v1805_v41  ;;  %v914_v27 = vmul.f32 %v1761_v10, %v1842_v23 }
  0xe9   :  { %v2266_v15 = vsel %vm236_vm3, %v815_v17, %v816_v14  ;;  %v2269_v46 = vsel %vm236_vm3, %v816_v14, %v818_v9  ;;  %v915_v1 = vmul.f32 %v1761_v10, %v2216_v4  ;;  %v910_v43 = vmul.f32 %v1761_v10, %v1844_v26 }
  0xea   :  { %2710 = vst [vmem:[#allocation43_spill] sm:$0xff] %v2269_v46  ;;  %v2280_v5 = vsel %vm236_vm3, %v810_v42, %v811_v52  ;;  %v813_v32 = vrot.slane %v800_v37, 1  ;;  %v927_v3 = vrot.slane %v913_v55, 2  ;;  %v928_v33 = vrot.slane %v914_v27, 2 }
  0xeb   :  { %v930_v58 = vrot.slane %v915_v1, 2  ;;  %v911_v17 = vmul.f32 %v1761_v10, %v1881_v7  ;;  %v922_v14 = vrot.slane %v910_v43, 2  ;;  %v912_v9 = vmul.f32 %v1761_v10, %v2236_v56 }
  0xec   :  { %434 = vrot.lane.b32.xlu1 %v2072_v20, %s1517_s8  ;;  %570 = vrot.lane.b32.xlu0 %v2149_v21, %s1516_s17  ;;  %v2711_v46 = vrot.slane %v2077_v62, 1  ;;  %v2712_v20 = vrot.slane %v2057_v47, 1  ;;  %v602_v42 = vrot.slane %v2161_v61, 1  ;;  %v2293_v37 = vsel %vm236_vm3, %v811_v52, %v813_v32 }
  0xed   :  { %v2296_v55 = vsel %vm349_vm4, %v927_v3, %v928_v33  ;;  %v585_v27 = vmul.f32 %v1705_v49, %v1755_v6  ;;  %v2301_v1 = vsel %vm349_vm4, %v928_v33, %v930_v58  ;;  %v923_v10 = vrot.slane %v911_v17, 2 }
  0xee   :  { %v558_v21 = vsel %vm236_vm3, %v2712_v20, %v2711_v46  ;;  %v925_v43 = vrot.slane %v912_v9, 2  ;;  %v2713_v52 = vmov %v2711_v46  ;;  %v604_v32 = vrot.slane %v2214_v13, 1 }
  0xef   :  { %v2306_v47 = vsel %vm349_vm4, %v922_v14, %v923_v10  ;;  %v560_v46 = vsel %vm236_vm3, %v2713_v52, %v559_v12  ;;  %v603_v3 = vsel %vm236_vm3, %v601_v39, %v602_v42  ;;  %v596_v33 = vrot.slane %v584_v48, 1  ;;  %v2714_v39 = vld [vmem:[#allocation17_spill] sm:$0xff] }
  0xf0   :  { %572 = vrot.lane.b32.xlu1 %v565_v63, %s1516_s17  ;;  %566 = vrot.lane.b32.xlu0 %v558_v21, %s1516_s17  ;;  %v2309_v61 = vsel %vm349_vm4, %v923_v10, %v925_v43  ;;  %v597_v58 = vrot.slane %v585_v27, 1  ;;  %v586_v63 = vmul.f32 %v1705_v49, %v2083_v22  ;;  %v605_v17 = vsel %vm236_vm3, %v602_v42, %v604_v32  ;;  %v2716_v27 = vld [vmem:[#allocation20_spill] sm:$0xff]  ;;  %v2717_v10 = vld [vmem:[#allocation18_spill] sm:$0xff] }
  0xf1   :  { %v661_v12 = vmul.f32 %v1714_v53, %v2011_v40  ;;  %v658_v49 = vmul.f32 %v1714_v53, %v2083_v22  ;;  %v2715_v9 = vrot.slane %v2714_v39, 2  ;;  %v701_v42 = vmul.f32 %v1717_v54, %v2011_v40  ;;  %v2719_v40 = vld [vmem:[#allocation19_spill] sm:$0xff] }
  0xf2   :  { %v598_v14 = vsel %vm236_vm3, %v596_v33, %v597_v58  ;;  %v599_v62 = vrot.slane %v586_v63, 1  ;;  %v2718_v53 = vrot.slane %v2717_v10, 2  ;;  %v2721_v33 = vld [vmem:[#allocation25_spill] sm:$0xff]  ;;  %v2730_v10 = vld [vmem:[#allocation15_spill] sm:$0xff] }
  0xf3   :  { %v676_v48 = vrot.slane %v661_v12, 2  ;;  %v671_v21 = vrot.slane %v658_v49, 2  ;;  %v716_v52 = vrot.slane %v701_v42, 2 }
  0xf4   :  { %568 = vrot.lane.b32.xlu1 %v560_v46, %s1516_s17  ;;  %610 = vrot.lane.b32.xlu0 %v603_v3, %s1517_s8  ;;  %v600_v13 = vsel %vm236_vm3, %v597_v58, %v599_v62  ;;  %v2720_v46 = vrot.slane %v2719_v40, 2  ;;  %v2722_v58 = vld [vmem:[#allocation21_spill] sm:$0xff] }
  0xf5   :  { %v677_v20 = vsel %vm349_vm4, %v2715_v9, %v676_v48  ;;  %v672_v43 = vsel %vm349_vm4, %v2718_v53, %v671_v21  ;;  %v2723_v63 = vrot.slane %v2722_v58, 2  ;;  %v2727_v48 = vld [vmem:[#allocation27_spill] sm:$0xff]  ;;  %v875_v53 = vmul.f32 %v2730_v10, %v2216_v4 }
  0xf6   :  { %v717_v32 = vsel %vm349_vm4, %v2720_v46, %v716_v52  ;;  %v872_v46 = vmul.f32 %v2730_v10, %v2236_v56 }
  0xf8   :  { %612 = vrot.lane.b32.xlu1 %v605_v17, %s1517_s8  ;;  %606 = vrot.lane.b32.xlu0 %v598_v14, %s1517_s8  ;;  %v161_v14 = vstv %s160_s11 }
  0xf9   :  { %v164_v49 = vmul.f32 %v161_v14, %v1606_v18  ;;  %v165_v52 = vmul.f32 %v161_v14, %v1627_v24  ;;  %v163_v24 = vmul.f32 %v161_v14, %v1640_v28 }
  0xfc   :  { %608 = vrot.lane.b32.xlu1 %v600_v13, %s1517_s8  ;;  %682 = vrot.lane.b32.xlu0 %v1868_v57, %s1516_s17  ;;  %v698_v57 = vmul.f32 %v1717_v54, %v2083_v22  ;;  %v2724_v22 = vld [vmem:[#allocation14_spill] sm:$0xff]  ;;  %v2726_v13 = vld [vmem:[#allocation23_spill] sm:$0xff] }
  0xfd   :  { %v835_v17 = vmul.f32 %v2724_v22, %v2216_v4  ;;  %v832_v12 = vmul.f32 %v2724_v22, %v2236_v56 }
  0xfe   :  { %v711_v3 = vrot.slane %v698_v57, 2  ;;  %v162_v57 = vmul.f32 %v161_v14, %v1608_v19 }
  0xff   :  { %v850_v62 = vrot.slane %v835_v17, 1  ;;  %v885_v17 = vrot.slane %v872_v46, 1 }
 0x100   :  { %684 = vrot.lane.b32.xlu1 %v677_v20, %s1516_s17  ;;  %678 = vrot.lane.b32.xlu0 %v2716_v27, %s1516_s17  ;;  %v712_v54 = vsel %vm349_vm4, %v2723_v63, %v711_v3  ;;  %v2728_v20 = vld [vmem:[#allocation24_spill] sm:$0xff]  ;;  %v845_v27 = vrot.slane %v832_v12, 1  ;;  %v2734_v12 = vrot.slane %v1965_v38, 1 }
 0x101   :  { %v2729_v21 = vrot.slane %v2728_v20, 1 }
 0x103   :  { %v851_v42 = vsel %vm236_vm3, %v2729_v21, %v850_v62  ;;  %v944_v21 = vmul.f32 %v1732_v60, %v2236_v56 }
 0x104   :  { %680 = vrot.lane.b32.xlu1 %v672_v43, %s1516_s17  ;;  %722 = vrot.lane.b32.xlu0 %v1909_v36, %s1517_s8  ;;  %v2725_v36 = vld [vmem:[#allocation22_spill] sm:$0xff]  ;;  %v2731_v43 = vld [vmem:[#allocation28_spill] sm:$0xff] }
 0x108   :  { %724 = vrot.lane.b32.xlu1 %v717_v32, %s1517_s8  ;;  %718 = vrot.lane.b32.xlu0 %v2721_v33, %s1517_s8  ;;  %v2732_v33 = vld [vmem:[#allocation26_spill] sm:$0xff] }
 0x109   :  { %v2733_v58 = vrot.slane %v2732_v33, 1 }
 0x10b   :  { %v846_v63 = vsel %vm236_vm3, %v2733_v58, %v845_v27 }
 0x10c   :  { %720 = vrot.lane.b32.xlu1 %v712_v54, %s1517_s8  ;;  %780 = vrot.lane.b32.xlu0 %v2725_v36, %s1517_s8  ;;  %v890_v54 = vrot.slane %v875_v53, 1  ;;  %v2737_v53 = vld [vmem:[#allocation29_spill] sm:$0xff] }
 0x110   :  { %782 = vrot.lane.b32.xlu1 %v2726_v13, %s1517_s8  ;;  %856 = vrot.lane.b32.xlu0 %v2727_v48, %s1516_s17  ;;  %v891_v13 = vsel %vm236_vm3, %v2734_v12, %v890_v54  ;;  %v947_v48 = vmul.f32 %v1732_v60, %v2216_v4  ;;  %v2739_v60 = vld [vmem:[#allocation16_spill] sm:$0xff] }
 0x112   :  { %v185_v39 = vpop.permute.xlu0 %184  ;;  %v962_v20 = vrot.slane %v947_v48, 2 }
 0x113   :  { %v194_v9 = vadd.f32 %v185_v39, %v164_v49  ;;  %v2735_v49 = vrot.slane %v1983_v35, 1 }
 0x114   :  { %858 = vrot.lane.b32.xlu1 %v851_v42, %s1516_s17  ;;  %852 = vrot.lane.b32.xlu0 %v2731_v43, %s1516_s17  ;;  %v2736_v42 = vld [vmem:[#allocation31_spill] sm:$0xff]  ;;  %v2738_v43 = vrot.slane %v2737_v53, 2 }
 0x115   :  { %v886_v39 = vsel %vm236_vm3, %v2735_v49, %v885_v17 }
 0x116   :  { %v187_v18 = vpop.permute.xlu1 %186  ;;  %v181_v40 = vpop.permute.xlu0 %180 }
 0x117   :  { %v195_v32 = vadd.f32 %v187_v18, %v165_v52  ;;  %v192_v3 = vadd.f32 %v181_v40, %v162_v57  ;;  %v963_v52 = vsel %vm349_vm4, %v2738_v43, %v962_v20  ;;  %v957_v57 = vrot.slane %v944_v21, 2  ;;  %v2740_v40 = vld [vmem:[#allocation33_spill] sm:$0xff] }
 0x118   :  { %854 = vrot.lane.b32.xlu1 %v846_v63, %s1516_s17  ;;  %896 = vrot.lane.b32.xlu0 %v2004_v31, %s1517_s8  ;;  %v987_v18 = vmul.f32 %v2739_v60, %v2216_v4  ;;  %v984_v63 = vmul.f32 %v2739_v60, %v2236_v56  ;;  %v2743_v4 = vld [vmem:[#allocation35_spill] sm:$0xff] }
 0x11a   :  { %v183_v19 = vpop.permute.xlu1 %182  ;;  %v211_v22 = vpop.permute.xlu0 %210  ;;  %v1002_v58 = vrot.slane %v987_v18, 2  ;;  %v997_v17 = vrot.slane %v984_v63, 2  ;;  %v2749_v63 = vld [vmem:[#allocation37_spill] sm:$0xff] }
 0x11b   :  { %v193_v36 = vadd.f32 %v183_v19, %v163_v24  ;;  %v220_v62 = vadd.f32 %v211_v22, %v194_v9  ;;  %v2744_v24 = vld [vmem:[#allocation32_spill] sm:$0xff] }
 0x11c   :  { %898 = vrot.lane.b32.xlu1 %v891_v13, %s1517_s8  ;;  %892 = vrot.lane.b32.xlu0 %v2016_v16, %s1517_s8  ;;  %v2745_v19 = vrot.slane %v2744_v24, 2 }
 0x11d   :  { %v253_v31 = vadd.f32 %v2119_v11, %v220_v62  ;;  %v2746_v62 = vld [vmem:[#allocation34_spill] sm:$0xff] }
 0x11e   :  { %v213_v28 = vpop.permute.xlu1 %212  ;;  %v207_v14 = vpop.permute.xlu0 %206  ;;  %v1003_v22 = vsel %vm349_vm4, %v2745_v19, %v1002_v58  ;;  %v2747_v12 = vrot.slane %v2746_v62, 2 }
 0x11f   :  { %v221_v9 = vadd.f32 %v213_v28, %v195_v32  ;;  %v218_v38 = vadd.f32 %v207_v14, %v192_v3  ;;  %v2741_v32 = vld [vmem:[#allocation30_spill] sm:$0xff] }
 0x120   :  { %894 = vrot.lane.b32.xlu1 %v886_v39, %s1517_s8  ;;  %968 = vrot.lane.b32.xlu0 %v2736_v42, %s1516_s17  ;;  %v2742_v3 = vrot.slane %v2741_v32, 2  ;;  %v998_v13 = vsel %vm349_vm4, %v2747_v12, %v997_v17 }
 0x121   :  { %v254_v16 = vadd.f32 %v2126_v45, %v221_v9  ;;  %v251_v11 = vadd.f32 %v2133_v25, %v218_v38 }
 0x122   :  { %v209_v27 = vpop.permute.xlu1 %208  ;;  %v2407_v10 = vpop.permute.xlu0 %472  ;;  %v958_v33 = vsel %vm349_vm4, %v2742_v3, %v957_v57 }
 0x123   :  { %v219_v35 = vadd.f32 %v209_v27, %v193_v36 }
 0x124   :  { %970 = vrot.lane.b32.xlu1 %v963_v52, %s1516_s17  ;;  %964 = vrot.lane.b32.xlu0 %v2740_v40, %s1516_s17 }
 0x125   :  { %v252_v45 = vadd.f32 %v2138_v44, %v219_v35 }
 0x126   :  { %v2418_v25 = vpop.permute.xlu1 %474  ;;  %v2420_v46 = vpop.permute.xlu0 %468 }
 0x128   :  { %966 = vrot.lane.b32.xlu1 %v958_v33, %s1516_s17  ;;  %1008 = vrot.lane.b32.xlu0 %v2743_v4, %s1517_s8  ;;  %v2748_v33 = vld [vmem:[#allocation36_spill] sm:$0xff]  ;;  %s1522_s17 = smov 64  }
 0x12a   :  { %v2430_v54 = vpop.permute.xlu1 %470  ;;  %v499_v44 = vpop.permute.xlu0 %498 }
 0x12c   :  { %1010 = vrot.lane.b32.xlu1 %v1003_v22, %s1517_s8  ;;  %1004 = vrot.lane.b32.xlu0 %v2104_v8, %s1517_s8  ;;  %v2750_v22 = vld [vmem:[#allocation38_spill] sm:$0xff] }
 0x12e   :  { %v2438_v36 = vpop.permute.xlu1 %500  ;;  %v2440_v56 = vpop.permute.xlu0 %494 }
 0x130   :  { %1006 = vrot.lane.b32.xlu1 %v998_v13, %s1517_s8 }
 0x132   :  { %v2446_v48 = vpop.permute.xlu1 %496  ;;  %v2448_v28 = vpop.permute.xlu0 %758 }
 0x136   :  { %v2450_v14 = vpop.permute.xlu1 %760  ;;  %v2452_v49 = vpop.permute.xlu0 %754 }
 0x13a   :  { %v2454_v39 = vpop.permute.xlu1 %756  ;;  %v2456_v8 = vpop.permute.xlu0 %784 }
 0x13e   :  { %v2458_v9 = vpop.permute.xlu1 %786  ;;  %v284_v38 = vpop.permute.xlu0 %283 }
 0x13f   :  { %v293_v42 = vadd.f32 %v284_v38, %v253_v31 }
 0x142   :  { %v286_v20 = vpop.permute.xlu1 %285  ;;  %v280_v21 = vpop.permute.xlu0 %279 }
 0x143   :  { %v294_v43 = vadd.f32 %v286_v20, %v254_v16  ;;  %v291_v52 = vadd.f32 %v280_v21, %v251_v11  ;;  %v449_v11 = vstv %s1407_s0 }
 0x144   :  { %v452_v38 = vmul.f32 %v449_v11, %v1672_v34  ;;  %v451_v34 = vmul.f32 %v449_v11, %v1755_v6 }
 0x146   :  { %v282_v27 = vpop.permute.xlu1 %281  ;;  %v324_v35 = vpop.permute.xlu0 %323 }
 0x147   :  { %v333_v53 = vadd.f32 %v324_v35, %v293_v42  ;;  %v292_v3 = vadd.f32 %v282_v27, %v252_v45  ;;  %v453_v27 = vmul.f32 %v449_v11, %v1707_v50 }
 0x149   :  { %v366_v57 = vadd.f32 %v2156_v2, %v333_v53 }
 0x14a   :  { %v326_v60 = vpop.permute.xlu1 %325  ;;  %v320_v18 = vpop.permute.xlu0 %319 }
 0x14b   :  { %v334_v40 = vadd.f32 %v326_v60, %v294_v43  ;;  %v331_v32 = vadd.f32 %v320_v18, %v291_v52  ;;  %v450_v60 = vmul.f32 %v449_v11, %v1709_v51 }
 0x14d   :  { %v367_v58 = vadd.f32 %v2748_v33, %v334_v40  ;;  %v364_v4 = vadd.f32 %v2749_v63, %v331_v32 }
 0x14e   :  { %v322_v24 = vpop.permute.xlu1 %321  ;;  %v397_v19 = vpop.permute.xlu0 %396 }
 0x14f   :  { %v332_v31 = vadd.f32 %v322_v24, %v292_v3  ;;  %v406_v12 = vadd.f32 %v397_v19, %v366_v57 }
 0x151   :  { %v365_v17 = vadd.f32 %v2750_v22, %v332_v31 }
 0x152   :  { %v399_v62 = vpop.permute.xlu1 %398  ;;  %v393_v16 = vpop.permute.xlu0 %392 }
 0x153   :  { %v407_v21 = vadd.f32 %v399_v62, %v367_v58  ;;  %v404_v45 = vadd.f32 %v393_v16, %v364_v4 }
 0x156   :  { %v395_v2 = vpop.permute.xlu1 %394  ;;  %v437_v13 = vpop.permute.xlu0 %436 }
 0x157   :  { %v446_v20 = vadd.f32 %v437_v13, %v406_v12  ;;  %v405_v40 = vadd.f32 %v395_v2, %v365_v17  ;;  %v2751_v17 = vld [vmem:[#allocation39_spill] sm:$0xff]  ;;  %v2752_v12 = vld [vmem:[#allocation40_spill] sm:$0xff] }
 0x159   :  { %v456_v42 = vadd.f32 %v452_v38, %v446_v20  ;;  %v2753_v38 = vld [vmem:[#allocation41_spill] sm:$0xff] }
 0x15a   :  { %v439_v35 = vpop.permute.xlu1 %438  ;;  %v433_v53 = vpop.permute.xlu0 %432 }
 0x15b   :  { %v482_v43 = vadd.f32 %v2407_v10, %v456_v42  ;;  %v447_v52 = vadd.f32 %v439_v35, %v407_v21  ;;  %v444_v18 = vadd.f32 %v433_v53, %v404_v45  ;;  %v2754_v42 = vld [vmem:[#allocation42_spill] sm:$0xff] }
 0x15d   :  { %v457_v57 = vadd.f32 %v453_v27, %v447_v52  ;;  %v454_v32 = vadd.f32 %v450_v60, %v444_v18  ;;  %v508_v3 = vadd.f32 %v499_v44, %v482_v43 }
 0x15e   :  { %v435_v33 = vpop.permute.xlu1 %434  ;;  %v571_v58 = vpop.permute.xlu0 %570 }
 0x15f   :  { %v483_v63 = vadd.f32 %v2418_v25, %v457_v57  ;;  %v480_v50 = vadd.f32 %v2420_v46, %v454_v32  ;;  %v445_v4 = vadd.f32 %v435_v33, %v405_v40  ;;  %v540_v24 = vadd.f32 %v2193_v0, %v508_v3 }
 0x160   :  { %v735_v40 = vstv %s1416_s12 }
 0x161   :  { %v455_v10 = vadd.f32 %v451_v34, %v445_v4  ;;  %v509_v19 = vadd.f32 %v2438_v36, %v483_v63  ;;  %v506_v51 = vadd.f32 %v2440_v56, %v480_v50  ;;  %v580_v16 = vadd.f32 %v571_v58, %v540_v24 }
 0x162   :  { %v573_v31 = vpop.permute.xlu1 %572  ;;  %v567_v22 = vpop.permute.xlu0 %566  ;;  %v738_v34 = vmul.f32 %v735_v40, %v1805_v41  ;;  %v739_v4 = vmul.f32 %v735_v40, %v1842_v23  ;;  %v737_v41 = vmul.f32 %v735_v40, %v1881_v7 }
 0x163   :  { %v481_v44 = vadd.f32 %v2430_v54, %v455_v10  ;;  %v541_v6 = vadd.f32 %v2196_v29, %v509_v19  ;;  %v538_v62 = vadd.f32 %v2751_v17, %v506_v51 }
 0x165   :  { %v507_v25 = vadd.f32 %v2446_v48, %v481_v44  ;;  %v581_v13 = vadd.f32 %v573_v31, %v541_v6  ;;  %v578_v36 = vadd.f32 %v567_v22, %v538_v62 }
 0x166   :  { %v569_v46 = vpop.permute.xlu1 %568  ;;  %v611_v11 = vpop.permute.xlu0 %610 }
 0x167   :  { %v539_v0 = vadd.f32 %v2752_v12, %v507_v25  ;;  %v620_v2 = vadd.f32 %v611_v11, %v580_v16 }
 0x169   :  { %v652_v56 = vadd.f32 %v2753_v38, %v620_v2  ;;  %v579_v29 = vadd.f32 %v569_v46, %v539_v0 }
 0x16a   :  { %v613_v20 = vpop.permute.xlu1 %612  ;;  %v607_v21 = vpop.permute.xlu0 %606 }
 0x16b   :  { %v621_v45 = vadd.f32 %v613_v20, %v581_v13  ;;  %v618_v54 = vadd.f32 %v607_v21, %v578_v36 }
 0x16d   :  { %v653_v27 = vadd.f32 %v2754_v42, %v621_v45  ;;  %v650_v35 = vadd.f32 %v2252_v59, %v618_v54 }
 0x16e   :  { %v609_v48 = vpop.permute.xlu1 %608  ;;  %v683_v53 = vpop.permute.xlu0 %682 }
 0x16f   :  { %v619_v43 = vadd.f32 %v609_v48, %v579_v29  ;;  %v692_v57 = vadd.f32 %v683_v53, %v652_v56 }
 0x171   :  { %v651_v52 = vadd.f32 %v2255_v30, %v619_v43  ;;  %v736_v30 = vmul.f32 %v735_v40, %v1844_v26  ;;  %v1035_v40 = vlaneseq }
 0x172   :  { %v685_v60 = vpop.permute.xlu1 %684  ;;  %v679_v18 = vpop.permute.xlu0 %678 }
 0x173   :  { %v693_v58 = vadd.f32 %v685_v60, %v653_v27  ;;  %v690_v63 = vadd.f32 %v679_v18, %v650_v35  ;;  %v1518_v60 = vmov 1983009808  }
 0x174   :  { %v1033_v18 = vunpack.c.l.s4 %v1518_v60 }
 0x176   :  { %v681_v32 = vpop.permute.xlu1 %680  ;;  %v723_v3 = vpop.permute.xlu0 %722 }
 0x177   :  { %v732_v33 = vadd.f32 %v723_v3, %v692_v57  ;;  %v691_v31 = vadd.f32 %v681_v32, %v651_v52  ;;  %v1034_v3 = vunpack.c.0.s8 %v1033_v18 }
 0x179   :  { %v742_v50 = vadd.f32 %v738_v34, %v732_v33  ;;  %v1036_v34 = vshrl.u32 %v1035_v40, 7 }
 0x17a   :  { %v725_v59 = vpop.permute.xlu1 %724  ;;  %v719_v24 = vpop.permute.xlu0 %718 }
 0x17b   :  { %v768_v10 = vadd.f32 %v2448_v28, %v742_v50  ;;  %v733_v19 = vadd.f32 %v725_v59, %v693_v58  ;;  %v730_v51 = vadd.f32 %v719_v24, %v690_v63 }
 0x17d   :  { %v743_v22 = vadd.f32 %v739_v4, %v733_v19  ;;  %v740_v44 = vadd.f32 %v736_v30, %v730_v51  ;;  %v794_v6 = vadd.f32 %v2456_v8, %v768_v10  ;;  %v2755_v8 = vld [vmem:[#allocation43_spill] sm:$0xff]  ;;  %v1037_v4 = vsub.s32 %v1034_v3, %v1036_v34 }
 0x17e   :  { %v721_v17 = vpop.permute.xlu1 %720  ;;  %v781_v62 = vpop.permute.xlu0 %780 }
 0x17f   :  { %v769_v16 = vadd.f32 %v2450_v14, %v743_v22  ;;  %v731_v23 = vadd.f32 %v721_v17, %v691_v31  ;;  %v766_v25 = vadd.f32 %v2452_v49, %v740_v44  ;;  %v826_v28 = vadd.f32 %v2266_v15, %v794_v6 }
 0x181   :  { %v741_v46 = vadd.f32 %v737_v41, %v731_v23  ;;  %v792_v11 = vadd.f32 %v781_v62, %v766_v25  ;;  %v795_v26 = vadd.f32 %v2458_v9, %v769_v16 }
 0x182   :  { %v783_v12 = vpop.permute.xlu1 %782  ;;  %v857_v0 = vpop.permute.xlu0 %856 }
 0x183   :  { %v767_v2 = vadd.f32 %v2454_v39, %v741_v46  ;;  %v827_v13 = vadd.f32 %v2755_v8, %v795_v26  ;;  %v824_v7 = vadd.f32 %v2280_v5, %v792_v11  ;;  %v866_v49 = vadd.f32 %v857_v0, %v826_v28 }
 0x185   :  { %v793_v36 = vadd.f32 %v783_v12, %v767_v2 }
 0x186   :  { %v859_v38 = vpop.permute.xlu1 %858  ;;  %v853_v14 = vpop.permute.xlu0 %852 }
 0x187   :  { %v825_v56 = vadd.f32 %v2293_v37, %v793_v36  ;;  %v867_v45 = vadd.f32 %v859_v38, %v827_v13  ;;  %v864_v54 = vadd.f32 %v853_v14, %v824_v7 }
 0x18a   :  { %v855_v20 = vpop.permute.xlu1 %854  ;;  %v897_v15 = vpop.permute.xlu0 %896 }
 0x18b   :  { %v906_v21 = vadd.f32 %v897_v15, %v866_v49  ;;  %v865_v35 = vadd.f32 %v855_v20, %v825_v56 }
 0x18d   :  { %v938_v9 = vadd.f32 %v2296_v55, %v906_v21 }
 0x18e   :  { %v899_v29 = vpop.permute.xlu1 %898  ;;  %v893_v42 = vpop.permute.xlu0 %892 }
 0x18f   :  { %v907_v39 = vadd.f32 %v899_v29, %v867_v45  ;;  %v904_v27 = vadd.f32 %v893_v42, %v864_v54 }
 0x191   :  { %v939_v5 = vadd.f32 %v2301_v1, %v907_v39  ;;  %v936_v48 = vadd.f32 %v2306_v47, %v904_v27  ;;  %v1021_v1 = vstv %s2646_s2  ;;  %s1519_s2 = smov 16  }
 0x192   :  { %v895_v53 = vpop.permute.xlu1 %894  ;;  %v969_v43 = vpop.permute.xlu0 %968 }
 0x193   :  { %v905_v37 = vadd.f32 %v895_v53, %v865_v35  ;;  %v978_v55 = vadd.f32 %v969_v43, %v938_v9 }
 0x195   :  { %v937_v52 = vadd.f32 %v2309_v61, %v905_v37 }
 0x196   :  { %v971_v57 = vpop.permute.xlu1 %970  ;;  %v965_v32 = vpop.permute.xlu0 %964 }
 0x197   :  { %v979_v63 = vadd.f32 %v971_v57, %v939_v5  ;;  %v976_v50 = vadd.f32 %v965_v32, %v936_v48 }
 0x19a   :  { %v967_v33 = vpop.permute.xlu1 %966  ;;  %v1009_v58 = vpop.permute.xlu0 %1008 }
 0x19b   :  { %v1018_v47 = vadd.f32 %v1009_v58, %v978_v55  ;;  %v977_v6 = vadd.f32 %v967_v33, %v937_v52 }
 0x19d   :  { %v1024_v59 = vadd.f32 %v1021_v1, %v1018_v47 }
 0x19e   :  { %v1011_v61 = vpop.permute.xlu1 %1010  ;;  %v1005_v24 = vpop.permute.xlu0 %1004 }
 0x19f   :  { %v1028_v10 = vmax.f32 %v1024_v59, 0.0  ;;  %v1019_v19 = vadd.f32 %v1011_v61, %v979_v63  ;;  %v1016_v30 = vadd.f32 %v1005_v24, %v976_v50 }
 0x1a1   :  { %v1045_v51 = vrot.slane %v1028_v10, %v1037_v4  ;;  %v1108_v31 = vcombine.high %v1028_v10, %v1028_v10  ;;  %v1025_v22 = vadd.f32 %v1021_v1, %v1019_v19  ;;  %v1022_v44 = vadd.f32 %v1021_v1, %v1016_v30 }
 0x1a2   :  { %v1007_v41 = vpop.permute.xlu1 %1006 }
 0x1a3   :  { %v2504_v17 = vrot.slane %v1108_v31, %v1037_v4  ;;  %v1029_v62 = vmax.f32 %v1025_v22, 0.0  ;;  %v1026_v16 = vmax.f32 %v1022_v44, 0.0  ;;  %v2506_v23 = vrot.slane %v1045_v51, 7 }
 0x1a4   :  { %v1017_v25 = vadd.f32 %v1007_v41, %v977_v6  ;;  %v1075_v28 = vcombine.high %v1045_v51, %v1045_v51 }
 0x1a5   :  { %v1181_v46 = vrot.slane %v1029_v62, %v1037_v4  ;;  %v1234_v11 = vcombine.high %v1029_v62, %v1029_v62  ;;  %v1038_v26 = vrot.slane %v1026_v16, %v1037_v4  ;;  %v1100_v12 = vcombine.high %v1026_v16, %v1026_v16 }
 0x1a6   :  { %v1023_v0 = vadd.f32 %v1021_v1, %v1017_v25  ;;  %v1078_v2 = vrot.slane %v1075_v28, 7  ;;  %v1118_v8 = vrot.slane %v2504_v17, 7  ;;  %v2511_v13 = vcombine.high %v2504_v17, %v2504_v17 }
 0x1a7   :  { %v2513_v7 = vrot.slane %v1234_v11, %v1037_v4  ;;  %v2517_v36 = vsel %vm1051_vm5, %v2506_v23, %v1038_v26  ;;  %v1062_v38 = vrot.slane %v1038_v26, 1  ;;  %v1074_v14 = vcombine.high %v1038_v26, %v1038_v26 }
 0x1a8   :  { %v1107_v56 = vrot.slane %v1100_v12, %v1037_v4  ;;  %v2519_v49 = vrot.slane %v1181_v46, 7  ;;  %v1027_v20 = vmax.f32 %v1023_v0, 0.0  ;;  %v1203_v15 = vcombine.high %v1181_v46, %v1181_v46 }
 0x1a9   :  { %v1088_v21 = vrot.slane %v1074_v14, 1  ;;  %v1065_v45 = vsel %vm1051_vm5, %v1045_v51, %v1062_v38  ;;  %v1079_v54 = vsel %vm1051_vm5, %v1078_v2, %v1074_v14  ;;  %v1244_v9 = vrot.slane %v2513_v7, 7 }
 0x1aa   :  { %v1128_v29 = vrot.slane %v1107_v56, 1  ;;  %v2524_v42 = vcombine.high %v1107_v56, %v1107_v56  ;;  %v1174_v39 = vrot.slane %v1027_v20, %v1037_v4  ;;  %v1226_v27 = vcombine.high %v1027_v20, %v1027_v20 }
 0x1ab   :  { %v1066_v35 = vsel %vm1053_vm6, %v1045_v51, %v1065_v45  ;;  %v1080_v5 = vsel %vm1053_vm6, %v1078_v2, %v1079_v54  ;;  %v1206_v48 = vrot.slane %v1203_v15, 7  ;;  %v1091_v53 = vsel %vm1051_vm5, %v1075_v28, %v1088_v21 }
 0x1ac   :  { %v2531_v43 = vsel %vm1051_vm5, %v2519_v49, %v1174_v39  ;;  %v1191_v37 = vrot.slane %v1174_v39, 1  ;;  %v1202_v52 = vcombine.high %v1174_v39, %v1174_v39  ;;  %v1233_v60 = vrot.slane %v1226_v27, %v1037_v4 }
 0x1ad   :  { %v1067_v18 = vsel %vm1055_vm7, %v1045_v51, %v1066_v35  ;;  %v1081_v40 = vsel %vm1055_vm7, %v1078_v2, %v1080_v5  ;;  %v1092_v57 = vsel %vm1053_vm6, %v1075_v28, %v1091_v53  ;;  %v1119_v32 = vsel %vm1051_vm5, %v1118_v8, %v1107_v56 }
 0x1ae   :  { %v1215_v55 = vrot.slane %v1202_v52, 1  ;;  %v1253_v3 = vrot.slane %v1233_v60, 1  ;;  %v1264_v34 = vcombine.high %v1233_v60, %v1233_v60  ;;  %v1068_v33 = vsel %vm1057_vm8, %v1045_v51, %v1067_v18 }
 0x1af   :  { %1069 = vrot.lane.b32.xlu0 %v1068_v33, %s1519_s2  ;;  %v1194_v1 = vsel %vm1051_vm5, %v1181_v46, %v1191_v37  ;;  %v1082_v58 = vsel %vm1057_vm8, %v1078_v2, %v1081_v40  ;;  %v1207_v47 = vsel %vm1051_vm5, %v1206_v48, %v1202_v52  ;;  %v1093_v63 = vsel %vm1055_vm7, %v1075_v28, %v1092_v57 }
 0x1b0   :  { %v1195_v50 = vsel %vm1053_vm6, %v1181_v46, %v1194_v1  ;;  %v1208_v4 = vsel %vm1053_vm6, %v1206_v48, %v1207_v47  ;;  %v1094_v59 = vsel %vm1057_vm8, %v1075_v28, %v1093_v63  ;;  %v1218_v61 = vsel %vm1051_vm5, %v1203_v15, %v1215_v55  ;;  %v1292_v55 = vld [vmem:[%s2647_s3 + $0x18] sm:$0x3] }
 0x1b1   :  { %v1196_v24 = vsel %vm1055_vm7, %v1181_v46, %v1195_v50  ;;  %v1209_v10 = vsel %vm1055_vm7, %v1206_v48, %v1208_v4  ;;  %v1219_v19 = vsel %vm1053_vm6, %v1203_v15, %v1218_v61  ;;  %v1120_v30 = vsel %vm1053_vm6, %v1118_v8, %v1119_v32  ;;  %v1290_v32 = vld [vmem:[%s2647_s3 + $0x8] sm:$0xff] }
 0x1b2   :  { %v1197_v51 = vsel %vm1057_vm8, %v1181_v46, %v1196_v24  ;;  %v1210_v31 = vsel %vm1057_vm8, %v1206_v48, %v1209_v10  ;;  %v1220_v22 = vsel %vm1055_vm7, %v1203_v15, %v1219_v19  ;;  %v1121_v44 = vsel %vm1055_vm7, %v1118_v8, %v1120_v30 }
 0x1b3   :  { %1198 = vrot.lane.b32.xlu1 %v1197_v51, %s1519_s2  ;;  %1083 = vrot.lane.b32.xlu0 %v1082_v58, %s1520_s15  ;;  %v1221_v6 = vsel %vm1057_vm8, %v1203_v15, %v1220_v22  ;;  %v1122_v41 = vsel %vm1057_vm8, %v1118_v8, %v1121_v44  ;;  %v1245_v62 = vsel %vm1051_vm5, %v1244_v9, %v1233_v60  ;;  %v1144_v16 = vrot.slane %v2511_v13, 7  ;;  %v1425_v44 = vld [vmem:[%s2648_s4] ss:$0 sm:$0xff] }
 0x1b4   :  { %v1246_v25 = vsel %vm1053_vm6, %v1244_v9, %v1245_v62  ;;  %v1131_v28 = vsel %vm1051_vm5, %v2504_v17, %v1128_v29  ;;  %v1256_v46 = vsel %vm1051_vm5, %v2513_v7, %v1253_v3  ;;  %v1265_v11 = vcombine.high %v2513_v7, %v2513_v7 }
 0x1b5   :  { %v1247_v26 = vsel %vm1055_vm7, %v1244_v9, %v1246_v25  ;;  %v1132_v12 = vsel %vm1053_vm6, %v2504_v17, %v1131_v28  ;;  %v1257_v0 = vsel %vm1053_vm6, %v2513_v7, %v1256_v46  ;;  %v1145_v2 = vsel %vm1051_vm5, %v1144_v16, %v2524_v42 }
 0x1b6   :  { %v1248_v8 = vsel %vm1057_vm8, %v1244_v9, %v1247_v26  ;;  %v1133_v38 = vsel %vm1055_vm7, %v2504_v17, %v1132_v12  ;;  %v1258_v14 = vsel %vm1055_vm7, %v2513_v7, %v1257_v0  ;;  %v1146_v56 = vsel %vm1053_vm6, %v1144_v16, %v1145_v2 }
 0x1b7   :  { %1211 = vrot.lane.b32.xlu1 %v1210_v31, %s1520_s15  ;;  %1095 = vrot.lane.b32.xlu0 %v1094_v59, %s1521_s16  ;;  %v1134_v20 = vsel %vm1057_vm8, %v2504_v17, %v1133_v38  ;;  %v1259_v15 = vsel %vm1057_vm8, %v2513_v7, %v1258_v14  ;;  %v1147_v21 = vsel %vm1055_vm7, %v1144_v16, %v1146_v56  ;;  %v1268_v45 = vrot.slane %v1265_v11, 7 }
 0x1b8   :  { %v1148_v54 = vsel %vm1057_vm8, %v1144_v16, %v1147_v21  ;;  %v1154_v9 = vrot.slane %v2524_v42, 1  ;;  %v1277_v29 = vrot.slane %v1264_v34, 1  ;;  %v1054_v39 = vsel %vm1053_vm6, %v2506_v23, %v2517_v36 }
 0x1b9   :  { %v1269_v27 = vsel %vm1051_vm5, %v1268_v45, %v1264_v34  ;;  %v1056_v17 = vsel %vm1055_vm7, %v2506_v23, %v1054_v39  ;;  %v1186_v7 = vsel %vm1053_vm6, %v2519_v49, %v2531_v43  ;;  %v1427_v3 = vpack.c.bf16 %v1292_v55, %v1290_v32 }
 0x1ba   :  { %v1270_v35 = vsel %vm1053_vm6, %v1268_v45, %v1269_v27  ;;  %v1157_v5 = vsel %vm1051_vm5, %v2511_v13, %v1154_v9  ;;  %v1280_v42 = vsel %vm1051_vm5, %v1265_v11, %v1277_v29  ;;  %v1058_v48 = vsel %vm1057_vm8, %v2506_v23, %v1056_v17 }
 0x1bb   :  { %1222 = vrot.lane.b32.xlu1 %v1221_v6, %s1521_s16  ;;  %1123 = vrot.lane.b32.xlu0 %v1122_v41, %s1522_s17  ;;  %v1271_v36 = vsel %vm1055_vm7, %v1268_v45, %v1270_v35  ;;  %v1158_v53 = vsel %vm1053_vm6, %v2511_v13, %v1157_v5  ;;  %v1281_v43 = vsel %vm1053_vm6, %v1265_v11, %v1280_v42 }
 0x1bc   :  { %1061 = vst.msk [vmem:[#allocation3] sm:$0x3] %vm1060_vm9, %v1058_v48  ;;  %v1272_v37 = vsel %vm1057_vm8, %v1268_v45, %v1271_v36  ;;  %v1159_v52 = vsel %vm1055_vm7, %v2511_v13, %v1158_v53  ;;  %v1282_v60 = vsel %vm1055_vm7, %v1265_v11, %v1281_v43  ;;  %v1187_v23 = vsel %vm1055_vm7, %v2519_v49, %v1186_v7 }
 0x1bd   :  { %v1160_v18 = vsel %vm1057_vm8, %v2511_v13, %v1159_v52  ;;  %v1283_v40 = vsel %vm1057_vm8, %v1265_v11, %v1282_v60  ;;  %v1188_v57 = vsel %vm1057_vm8, %v2519_v49, %v1187_v23  ;;  %v1289_v13 = vld [vmem:[%s2647_s3] sm:$0xff]  ;;  %v1291_v49 = vld [vmem:[%s2647_s3 + $0x10] sm:$0x3]  ;;  %1428 = vmatprep.subr.bf16.mxu0 %v1427_v3 }
 0x1be   :  { %1190 = vst.msk [vmem:[#allocation3 + $0x2] sm:$0x3] %vm1060_vm9, %v1188_v57  ;;  %v1429_v34 = vpack.c.bf16 %v1291_v49, %v1289_v13 }
 0x1bf   :  { %1249 = vrot.lane.b32.xlu1 %v1248_v8, %s1522_s17  ;;  %1135 = vrot.lane.b32.xlu0 %v1134_v20, %s1523_s22 }
 0x1c0   :  { %1430 = vmatpush1.bf16.xpose.msra.mxu0 %v1429_v34 }
 0x1c3   :  { %1260 = vrot.lane.b32.xlu1 %v1259_v15, %s1523_s22  ;;  %1149 = vrot.lane.b32.xlu0 %v1148_v54, %s1524_s27 }
 0x1c7   :  { %1273 = vrot.lane.b32.xlu1 %v1272_v37, %s1524_s27  ;;  %1161 = vrot.lane.b32.xlu0 %v1160_v18, %s1525_s28 }
 0x1cb   :  { %1284 = vrot.lane.b32.xlu1 %v1283_v40, %s1525_s28 }
 0x221   :  { %v1070_v33 = vpop.permute.xlu0 %1069 }
 0x222   :  { %1073 = vst.msk [vmem:[#allocation3] sm:$0x3] %vm1072_vm10, %v1070_v33 }
 0x225   :  { %v1199_v1 = vpop.permute.xlu1 %1198  ;;  %v1084_v58 = vpop.permute.xlu0 %1083 }
 0x226   :  { %1201 = vst.msk [vmem:[#allocation3 + $0x2] sm:$0x3] %vm1072_vm10, %v1199_v1 }
 0x227   :  { %1087 = vst.msk [vmem:[#allocation3] sm:$0x3] %vm1086_vm11, %v1084_v58 }
 0x229   :  { %v1212_v47 = vpop.permute.xlu1 %1211  ;;  %v1096_v63 = vpop.permute.xlu0 %1095 }
 0x22a   :  { %1214 = vst.msk [vmem:[#allocation3 + $0x2] sm:$0x3] %vm1086_vm11, %v1212_v47 }
 0x22b   :  { %1099 = vst.msk [vmem:[#allocation3] sm:$0x3] %vm1098_vm12, %v1096_v63 }
 0x22d   :  { %v1223_v50 = vpop.permute.xlu1 %1222  ;;  %v1124_v4 = vpop.permute.xlu0 %1123 }
 0x22e   :  { %1225 = vst.msk [vmem:[#allocation3 + $0x2] sm:$0x3] %vm1098_vm12, %v1223_v50 }
 0x22f   :  { %1127 = vst.msk [vmem:[#allocation3] sm:$0x3] %vm1126_vm13, %v1124_v4 }
 0x231   :  { %v1250_v59 = vpop.permute.xlu1 %1249  ;;  %v1136_v61 = vpop.permute.xlu0 %1135 }
 0x232   :  { %1252 = vst.msk [vmem:[#allocation3 + $0x2] sm:$0x3] %vm1126_vm13, %v1250_v59 }
 0x233   :  { %1139 = vst.msk [vmem:[#allocation3] sm:$0x3] %vm1138_vm14, %v1136_v61 }
 0x235   :  { %v1261_v24 = vpop.permute.xlu1 %1260  ;;  %v1150_v10 = vpop.permute.xlu0 %1149 }
 0x236   :  { %1263 = vst.msk [vmem:[#allocation3 + $0x2] sm:$0x3] %vm1138_vm14, %v1261_v24 }
 0x237   :  { %1153 = vst.msk [vmem:[#allocation3] sm:$0x3] %vm1152_vm15, %v1150_v10 }
 0x239   :  { %v1274_v19 = vpop.permute.xlu1 %1273  ;;  %v1162_v30 = vpop.permute.xlu0 %1161 }
 0x23a   :  { %1276 = vst.msk [vmem:[#allocation3 + $0x2] sm:$0x3] %vm1152_vm15, %v1274_v19 }
 0x23b   :  { %1165 = vst.msk [vmem:[#allocation3] sm:$0x3] %vm1164_vm0, %v1162_v30 }
 0x23d   :  { %v1285_v51 = vpop.permute.xlu1 %1284 }
 0x23e   :  { %1287 = vst.msk [vmem:[#allocation3 + $0x2] sm:$0x3] %vm1164_vm0, %v1285_v51 }
 0x245   :  { %v1426_v31 = vld.sshfl [vmem:[#allocation3] sm:$0x33 pattern:$0x76325410] }
 0x246   :  { %v1308_v22 = vcombine.high %v1426_v31, %v1426_v31 }
 0x248   :  { %1375 = vmatprep.mubr.f32.mxu0 %v1308_v22 }
 0x249   :  { %1376 = vmatmul.mubr.f32.vlgmr.msra.gmra.mrb[0].mxu0 %v1426_v31 }
 0x31c   :  { %v1377_v6 = vpop.f32.mrb[0].mxu0 }
 0x31d   :  { %v1378_v41 = vadd.f32 %v1425_v44, %v1377_v6  ;;  %v1379_v62 = vpop.f32.mrb[1].mxu0 }
 0x31f   :  { %1382 = vst.msk [vmem:[#allocation10] sm:$0x3] %vm1381_vm1, %v1378_v41 }
 0x320   :  { %1493 = shalt.err (!%p1490_p3)
}
 0x321   :  { %s1494_s9 = scalar_lea.hbm %s2649_s5, 32 }
 0x322   :  { %p1495_p4 = scmp.ne.s32.totalorder %s2649_s5, %s1494_s9  ;;  %p1498_p5 = scmp.lt.u32.totalorder %s1494_s9, %s2649_s5 }
 0x324   :  { %p1500_p6 = pnand %p1498_p5, %p1495_p4 }
 0x326   :  { %1503 = shalt.err (!%p1500_p6)
}
 0x327   :  { %1392 = dma.vmem_to_hbm [thread:$0]  %s1390_s1, 32, %s2649_s5, [#allocation7]  }
 0x328   :  { %1508 = dma.done.wait [#allocation7], 32  }
 0x329   :  { %1509 = vsyncadd [#allocation7], 4294967264 }
 0x32a   :  { %1396 = vsyncpa [#allocation6], 1 }
 0x32b   :  { %1397 = vsyncpa [#allocation7], 1 }
 0x32c   :  { %1398 = vsyncpa [#allocation8], 1 }

</bundles_post_ra>
